<compile_context>
chip_gen: v7x
topology: tpu7x:2x2x1
jax: 0.10.0
libtpu: 0.0.40
codegen_flags: <defaults>
</compile_context>

<pallas_src>
import math
import functools

import jax
import jax.numpy as jnp
from jax.experimental import pallas as pl
from jax.experimental.pallas import tpu as pltpu

# PyTorch uses -sys.maxsize - 1 as the additive fill value.
NEG_FILL = float(-(2 ** 63))


def mha_kernel(q_ref, k_ref, v_ref, mask_ref,
               wq_ref, bq_ref, wk_ref, bk_ref, wv_ref, bv_ref,
               wo_ref, bo_ref,
               out_ref, scores_ref,
               *, num_heads: int, d_k: int, compute_dtype):
    f32 = jnp.float32

    # Per-(batch, q-tile) blocks.
    q = q_ref[0]          # (tq, d_embed)  compute_dtype
    k = k_ref[0]          # (Lk, d_embed)  compute_dtype
    v = v_ref[0]          # (Lk, d_embed)  compute_dtype
    mask = mask_ref[0]    # (tq, Lk)       f32

    # Linear projections: MXU matmuls in compute_dtype, f32 accumulation,
    # biases kept in f32.
    Q = jnp.dot(q, wq_ref[...], preferred_element_type=f32) + bq_ref[...]
    K = jnp.dot(k, wk_ref[...], preferred_element_type=f32) + bk_ref[...]
    V = jnp.dot(v, wv_ref[...], preferred_element_type=f32) + bv_ref[...]

    tq = Q.shape[0]
    lk = K.shape[0]

    # One reshape + transpose per tensor (no per-head lane slicing / concat).
    Qh = jnp.transpose(Q.reshape(tq, num_heads, d_k), (1, 0, 2))   # (H, tq, d_k)
    Kh = jnp.transpose(K.reshape(lk, num_heads, d_k), (1, 0, 2))   # (H, Lk, d_k)
    Vh = jnp.transpose(V.reshape(lk, num_heads, d_k), (1, 0, 2))   # (H, Lk, d_k)

    # Replicate PyTorch mask semantics exactly:
    #   m = 1 - mask ; m[m == 1] = -(2**63) ; logits += m ; logits /= sqrt(Lk)
    madd = 1.0 - mask
    madd = jnp.where(madd == 1.0, f32(NEG_FILL), madd)

    # Batched QK^T over heads — MXU fed directly, no explicit K transpose.
    react = jnp.einsum('hqd,hkd->hqk',
                       Qh.astype(compute_dtype), Kh.astype(compute_dtype),
                       preferred_element_type=f32)                 # (H, tq, Lk)
    # NOTE: the module divides by sqrt(reactivity.shape[-1]) == sqrt(Lk).
    react = (react + madd[None]) * f32(1.0 / math.sqrt(lk))

    # Numerically-stable softmax along keys, entirely in f32.
    react = react - jnp.max(react, axis=-1, keepdims=True)
    p = jnp.exp(react)
    inv_denom = pl.reciprocal(jnp.sum(p, axis=-1, keepdims=True))  # (H, tq, 1)
    p = p * inv_denom

    scores_ref[0] = p.astype(scores_ref.dtype)

    # Batched scores @ V over heads.
    ctx = jnp.einsum('hqk,hkd->hqd',
                     p.astype(compute_dtype), Vh.astype(compute_dtype),
                     preferred_element_type=f32)                   # (H, tq, d_k)
    blended = jnp.transpose(ctx, (1, 0, 2)).reshape(tq, num_heads * d_k)

    out = jnp.dot(blended.astype(compute_dtype), wo_ref[...],
                  preferred_element_type=f32) + bo_ref[...]
    out_ref[0] = out.astype(out_ref.dtype)


def qkv_multihead_attention(query, key, value, attention_mask, params,
                            *, num_heads: int,
                            compute_dtype=jnp.bfloat16,
                            scores_dtype=jnp.float32,
                            q_tile: int = 256):
    """query/key/value: (B, L, d_embed) f32; attention_mask: (B, Lq, Lk) f32.

    Weights are pre-transposed to (in_features, out_features); biases (1, out).
    Returns (blended (B, Lq, d_embed) f32, attention_scores (B, H, Lq, Lk)).
    """
    B, Lq, d_embed = query.shape
    Lk = key.shape[1]
    d_model = params["wq"].shape[1]
    assert d_model % num_heads == 0
    d_k = d_model // num_heads

    # Query-tile size: full Lq if small, else q_tile (multiple of 8/128).
    tq = Lq if Lq <= q_tile else q_tile
    nq = pl.cdiv(Lq, tq)

    # MXU operands in compute_dtype (bf16 by default); biases stay f32 so the
    # f32-accumulated matmul results keep full precision.
    qc = query.astype(compute_dtype)
    kc = key.astype(compute_dtype)
    vc = value.astype(compute_dtype)
    wq = params["wq"].astype(compute_dtype)
    wk = params["wk"].astype(compute_dtype)
    wv = params["wv"].astype(compute_dtype)
    wo = params["wo"].astype(compute_dtype)

    kernel = functools.partial(mha_kernel, num_heads=num_heads, d_k=d_k,
                               compute_dtype=compute_dtype)

    const2d = lambda b, qi: (0, 0)

    out_shapes = (
        jax.ShapeDtypeStruct((B, Lq, d_embed), jnp.float32),
        jax.ShapeDtypeStruct((B, num_heads, Lq, Lk), scores_dtype),
    )

    return pl.pallas_call(
        kernel,
        out_shape=out_shapes,
        grid=(B, nq),
        in_specs=[
            pl.BlockSpec((1, tq, d_embed), lambda b, qi: (b, qi, 0)),   # query tile
            pl.BlockSpec((1, Lk, d_embed), lambda b, qi: (b, 0, 0)),    # key (full)
            pl.BlockSpec((1, Lk, d_embed), lambda b, qi: (b, 0, 0)),    # value (full)
            pl.BlockSpec((1, tq, Lk), lambda b, qi: (b, qi, 0)),        # mask tile
            pl.BlockSpec((d_embed, d_model), const2d),                  # wq (in,out)
            pl.BlockSpec((1, d_model), const2d),                        # bq
            pl.BlockSpec((d_embed, d_model), const2d),                  # wk
            pl.BlockSpec((1, d_model), const2d),                        # bk
            pl.BlockSpec((d_embed, d_model), const2d),                  # wv
            pl.BlockSpec((1, d_model), const2d),                        # bv
            pl.BlockSpec((d_model, d_embed), const2d),                  # wo (in,out)
            pl.BlockSpec((1, d_embed), const2d),                        # bo
        ],
        out_specs=(
            pl.BlockSpec((1, tq, d_embed), lambda b, qi: (b, qi, 0)),           # blended
            pl.BlockSpec((1, num_heads, tq, Lk), lambda b, qi: (b, 0, qi, 0)),  # scores
        ),
        compiler_params=pltpu.CompilerParams(
            dimension_semantics=("parallel", "parallel"),
            vmem_limit_bytes=48 * 1024 * 1024),
    )(qc, kc, vc, attention_mask,
      wq, params["bq"], wk, params["bk"], wv, params["bv"], wo, params["bo"])


def _reference(query, key, value, attention_mask, params, *, num_heads):
    """Pure-JAX replica of the PyTorch forward, for verification."""
    B, Lq, d_embed = query.shape
    d_model = params["wq"].shape[1]
    d_k = d_model // num_heads

    def proj(x, w, b):
        return x @ w + b[0]

    def split(x):
        B_, L_, _ = x.shape
        return x.reshape(B_, L_, num_heads, d_k).transpose(0, 2, 1, 3)

    Q = split(proj(query, params["wq"], params["bq"]))
    K = split(proj(key, params["wk"], params["bk"]))
    V = split(proj(value, params["wv"], params["bv"]))
    react = jnp.einsum("bhqd,bhkd->bhqk", Q, K)
    m = 1.0 - attention_mask
    m = jnp.where(m == 1.0, jnp.float32(NEG_FILL), m)
    react = react + m[:, None, :, :]
    react = react / math.sqrt(react.shape[-1])          # module: sqrt(key_length)
    scores = jax.nn.softmax(react, axis=-1)
    blended = jnp.einsum("bhqk,bhkd->bhqd", scores, V)
    blended = blended.transpose(0, 2, 1, 3).reshape(B, Lq, d_model)
    out = blended @ params["wo"] + params["bo"][0]
    return out, scores


if __name__ == "__main__":
    # Small shapes consistent with the module.
    B, L = 2, 8
    d_embed, d_model, num_heads = 32, 32, 4

    key0 = jax.random.PRNGKey(0)
    ks = jax.random.split(key0, 12)

    def init_linear(kw, kb, fan_in, fan_out):
        # Deterministic init in the spirit of nn.Linear (uniform +-1/sqrt(fan_in)),
        # stored pre-transposed as (in, out).
        bound = 1.0 / math.sqrt(fan_in)
        w = jax.random.uniform(kw, (fan_in, fan_out), jnp.float32, -bound, bound)
        b = jax.random.uniform(kb, (1, fan_out), jnp.float32, -bound, bound)
        return w, b

    wq, bq = init_linear(ks[0], ks[1], d_embed, d_model)
    wk, bk = init_linear(ks[2], ks[3], d_embed, d_model)
    wv, bv = init_linear(ks[4], ks[5], d_embed, d_model)
    wo, bo = init_linear(ks[6], ks[7], d_model, d_embed)
    params = dict(wq=wq, bq=bq, wk=wk, bk=bk, wv=wv, bv=bv, wo=wo, bo=bo)

    query = jax.random.normal(ks[8], (B, L, d_embed), jnp.float32)
    key_t = jax.random.normal(ks[9], (B, L, d_embed), jnp.float32)
    value = jax.random.normal(ks[10], (B, L, d_embed), jnp.float32)

    # Binary attention mask (1 = attend), e.g. causal lower-triangular.
    attention_mask = jnp.tril(jnp.ones((L, L), jnp.float32))[None].repeat(B, axis=0)

    ref_out, ref_scores = _reference(
        query, key_t, value, attention_mask, params, num_heads=num_heads)

    # 1) Exact path (f32 MXU operands) — bit-faithful to the module arithmetic.
    out32, sc32 = qkv_multihead_attention(
        query, key_t, value, attention_mask, params,
        num_heads=num_heads, compute_dtype=jnp.float32)
    out32 = jax.block_until_ready(out32)
    sc32 = jax.block_until_ready(sc32)
    assert out32.shape == (B, L, d_embed)
    assert sc32.shape == (B, num_heads, L, L)
    assert jnp.allclose(out32, ref_out, atol=1e-4, rtol=1e-4)
    assert jnp.allclose(sc32, ref_scores, atol=1e-5, rtol=1e-5)

    # 2) Default fast path: bf16 MXU operands, f32 accumulation / softmax.
    out16, sc16 = qkv_multihead_attention(
        query, key_t, value, attention_mask, params, num_heads=num_heads)
    out16 = jax.block_until_ready(out16)
    sc16 = jax.block_until_ready(sc16)
    assert jnp.allclose(out16, ref_out, atol=5e-2, rtol=5e-2)
    assert jnp.allclose(sc16, ref_scores, atol=3e-2, rtol=3e-2)

    print("KERNEL_OK")
</pallas_src>

<mosaic_0001>
module attributes {stable_mosaic.version = 11 : i64} {
  func.func @mha_kernel(%arg0: i32, %arg1: i32, %arg2: memref<1x8x32xf32, #tpu.memory_space<vmem>>, %arg3: memref<1x8x32xf32, #tpu.memory_space<vmem>>, %arg4: memref<1x8x32xf32, #tpu.memory_space<vmem>>, %arg5: memref<1x8x8xf32, #tpu.memory_space<vmem>>, %arg6: memref<32x32xf32, #tpu.memory_space<vmem>>, %arg7: memref<1x32xf32, #tpu.memory_space<vmem>>, %arg8: memref<32x32xf32, #tpu.memory_space<vmem>>, %arg9: memref<1x32xf32, #tpu.memory_space<vmem>>, %arg10: memref<32x32xf32, #tpu.memory_space<vmem>>, %arg11: memref<1x32xf32, #tpu.memory_space<vmem>>, %arg12: memref<32x32xf32, #tpu.memory_space<vmem>>, %arg13: memref<1x32xf32, #tpu.memory_space<vmem>>, %arg14: memref<1x8x32xf32, #tpu.memory_space<vmem>>, %arg15: memref<1x4x8x8xf32, #tpu.memory_space<vmem>>) attributes {dimension_semantics = [#tpu.dimension_semantics<parallel>, #tpu.dimension_semantics<parallel>], iteration_bounds = array<i64: 2, 1>, scalar_prefetch = 0 : i64, scratch_operands = 0 : i64, tpu.core_type = #tpu.core_type<tc>, window_params = [{transform_indices = @transform_0, window_bounds = array<i64: 1, 8, 32>}, {transform_indices = @transform_1, window_bounds = array<i64: 1, 8, 32>}, {transform_indices = @transform_2, window_bounds = array<i64: 1, 8, 32>}, {transform_indices = @transform_3, window_bounds = array<i64: 1, 8, 8>}, {pipeline_mode = #tpu.pipeline_mode<synchronous>, transform_indices = @transform_4, window_bounds = array<i64: 32, 32>}, {pipeline_mode = #tpu.pipeline_mode<synchronous>, transform_indices = @transform_5, window_bounds = array<i64: 1, 32>}, {pipeline_mode = #tpu.pipeline_mode<synchronous>, transform_indices = @transform_6, window_bounds = array<i64: 32, 32>}, {pipeline_mode = #tpu.pipeline_mode<synchronous>, transform_indices = @transform_7, window_bounds = array<i64: 1, 32>}, {pipeline_mode = #tpu.pipeline_mode<synchronous>, transform_indices = @transform_8, window_bounds = array<i64: 32, 32>}, {pipeline_mode = #tpu.pipeline_mode<synchronous>, transform_indices = @transform_9, window_bounds = array<i64: 1, 32>}, {pipeline_mode = #tpu.pipeline_mode<synchronous>, transform_indices = @transform_10, window_bounds = array<i64: 32, 32>}, {pipeline_mode = #tpu.pipeline_mode<synchronous>, transform_indices = @transform_11, window_bounds = array<i64: 1, 32>}, {transform_indices = @transform_12, window_bounds = array<i64: 1, 8, 32>}, {transform_indices = @transform_13, window_bounds = array<i64: 1, 4, 8, 8>}]} {
    %c0 = arith.constant 0 : index
    %c0_0 = arith.constant 0 : index
    %c0_1 = arith.constant 0 : index
    %0 = vector.load %arg2[%c0, %c0_0, %c0_1] : memref<1x8x32xf32, #tpu.memory_space<vmem>>, vector<1x8x32xf32>
    %1 = vector.shape_cast %0 : vector<1x8x32xf32> to vector<8x32xf32>
    %c0_2 = arith.constant 0 : index
    %c0_3 = arith.constant 0 : index
    %c0_4 = arith.constant 0 : index
    %2 = vector.load %arg3[%c0_2, %c0_3, %c0_4] : memref<1x8x32xf32, #tpu.memory_space<vmem>>, vector<1x8x32xf32>
    %3 = vector.shape_cast %2 : vector<1x8x32xf32> to vector<8x32xf32>
    %c0_5 = arith.constant 0 : index
    %c0_6 = arith.constant 0 : index
    %c0_7 = arith.constant 0 : index
    %4 = vector.load %arg4[%c0_5, %c0_6, %c0_7] : memref<1x8x32xf32, #tpu.memory_space<vmem>>, vector<1x8x32xf32>
    %5 = vector.shape_cast %4 : vector<1x8x32xf32> to vector<8x32xf32>
    %c0_8 = arith.constant 0 : index
    %c0_9 = arith.constant 0 : index
    %c0_10 = arith.constant 0 : index
    %6 = vector.load %arg5[%c0_8, %c0_9, %c0_10] : memref<1x8x8xf32, #tpu.memory_space<vmem>>, vector<1x8x8xf32>
    %7 = vector.shape_cast %6 : vector<1x8x8xf32> to vector<8x8xf32>
    %c0_11 = arith.constant 0 : index
    %c0_12 = arith.constant 0 : index
    %8 = vector.load %arg6[%c0_11, %c0_12] : memref<32x32xf32, #tpu.memory_space<vmem>>, vector<32x32xf32>
    %cst = arith.constant dense<0.000000e+00> : vector<8x32xf32>
    %9 = tpu.matmul %1, %8, %cst {dimension_numbers = #tpu.dot_dimension_numbers<[1], [0], [0], [1], [0, 0, 1, 1], [], []>} : vector<8x32xf32>, vector<32x32xf32>, vector<8x32xf32> -> vector<8x32xf32>
    %c0_13 = arith.constant 0 : index
    %c0_14 = arith.constant 0 : index
    %10 = vector.load %arg7[%c0_13, %c0_14] : memref<1x32xf32, #tpu.memory_space<vmem>>, vector<1x32xf32>
    %11 = vector.broadcast %10 : vector<1x32xf32> to vector<8x32xf32>
    %12 = arith.addf %9, %11 : vector<8x32xf32>
    %c0_15 = arith.constant 0 : index
    %c0_16 = arith.constant 0 : index
    %13 = vector.load %arg8[%c0_15, %c0_16] : memref<32x32xf32, #tpu.memory_space<vmem>>, vector<32x32xf32>
    %cst_17 = arith.constant dense<0.000000e+00> : vector<8x32xf32>
    %14 = tpu.matmul %3, %13, %cst_17 {dimension_numbers = #tpu.dot_dimension_numbers<[1], [0], [0], [1], [0, 0, 1, 1], [], []>} : vector<8x32xf32>, vector<32x32xf32>, vector<8x32xf32> -> vector<8x32xf32>
    %c0_18 = arith.constant 0 : index
    %c0_19 = arith.constant 0 : index
    %15 = vector.load %arg9[%c0_18, %c0_19] : memref<1x32xf32, #tpu.memory_space<vmem>>, vector<1x32xf32>
    %16 = vector.broadcast %15 : vector<1x32xf32> to vector<8x32xf32>
    %17 = arith.addf %14, %16 : vector<8x32xf32>
    %c0_20 = arith.constant 0 : index
    %c0_21 = arith.constant 0 : index
    %18 = vector.load %arg10[%c0_20, %c0_21] : memref<32x32xf32, #tpu.memory_space<vmem>>, vector<32x32xf32>
    %cst_22 = arith.constant dense<0.000000e+00> : vector<8x32xf32>
    %19 = tpu.matmul %5, %18, %cst_22 {dimension_numbers = #tpu.dot_dimension_numbers<[1], [0], [0], [1], [0, 0, 1, 1], [], []>} : vector<8x32xf32>, vector<32x32xf32>, vector<8x32xf32> -> vector<8x32xf32>
    %c0_23 = arith.constant 0 : index
    %c0_24 = arith.constant 0 : index
    %20 = vector.load %arg11[%c0_23, %c0_24] : memref<1x32xf32, #tpu.memory_space<vmem>>, vector<1x32xf32>
    %21 = vector.broadcast %20 : vector<1x32xf32> to vector<8x32xf32>
    %22 = arith.addf %19, %21 : vector<8x32xf32>
    %23 = vector.shape_cast %12 : vector<8x32xf32> to vector<8x4x8xf32>
    %24 = tpu.transpose %23, [1, 0, 2] : vector<8x4x8xf32> -> vector<4x8x8xf32>
    %25 = vector.shape_cast %17 : vector<8x32xf32> to vector<8x4x8xf32>
    %26 = tpu.transpose %25, [1, 0, 2] : vector<8x4x8xf32> -> vector<4x8x8xf32>
    %27 = vector.shape_cast %22 : vector<8x32xf32> to vector<8x4x8xf32>
    %28 = tpu.transpose %27, [1, 0, 2] : vector<8x4x8xf32> -> vector<4x8x8xf32>
    %cst_25 = arith.constant 1.000000e+00 : f32
    %29 = vector.broadcast %cst_25 : f32 to vector<8x8xf32>
    %30 = arith.subf %29, %7 : vector<8x8xf32>
    %cst_26 = arith.constant 1.000000e+00 : f32
    %31 = vector.broadcast %cst_26 : f32 to vector<8x8xf32>
    %32 = arith.cmpf oeq, %30, %31 : vector<8x8xf32>
    %cst_27 = arith.constant -9.22337203E+18 : f32
    %33 = vector.broadcast %cst_27 : f32 to vector<8x8xf32>
    %34 = arith.select %32, %33, %30 : vector<8x8xi1>, vector<8x8xf32>
    "tpu.trace_start"() <{level = 10 : i32, message = "hqd,hkd->hqk"}> : () -> ()
    %cst_28 = arith.constant dense<0.000000e+00> : vector<4x8x8xf32>
    %35 = tpu.matmul %24, %26, %cst_28 {dimension_numbers = #tpu.dot_dimension_numbers<[2], [2], [1], [1], [0, 0, 0, 1, 1, 1], [0], [0]>} : vector<4x8x8xf32>, vector<4x8x8xf32>, vector<4x8x8xf32> -> vector<4x8x8xf32>
    "tpu.trace_stop"() : () -> ()
    %36 = vector.shape_cast %34 : vector<8x8xf32> to vector<1x8x8xf32>
    %37 = vector.broadcast %36 : vector<1x8x8xf32> to vector<4x8x8xf32>
    %38 = arith.addf %35, %37 : vector<4x8x8xf32>
    %cst_29 = arith.constant 0.353553385 : f32
    %39 = vector.broadcast %cst_29 : f32 to vector<4x8x8xf32>
    %40 = arith.mulf %38, %39 : vector<4x8x8xf32>
    %cst_30 = arith.constant dense<0xFF800000> : vector<4x8xf32>
    %41 = vector.multi_reduction <maximumf>, %40, %cst_30 [2] : vector<4x8x8xf32> to vector<4x8xf32>
    %42 = vector.shape_cast %41 : vector<4x8xf32> to vector<4x8x1xf32>
    %43 = vector.broadcast %42 : vector<4x8x1xf32> to vector<4x8x8xf32>
    %44 = arith.subf %40, %43 : vector<4x8x8xf32>
    %45 = math.exp %44 : vector<4x8x8xf32>
    %cst_31 = arith.constant dense<0.000000e+00> : vector<4x8xf32>
    %46 = vector.multi_reduction <add>, %45, %cst_31 [2] : vector<4x8x8xf32> to vector<4x8xf32>
    %47 = vector.shape_cast %46 : vector<4x8xf32> to vector<4x8x1xf32>
    %48 = tpu.reciprocal %47 : vector<4x8x1xf32> -> vector<4x8x1xf32>
    %49 = vector.broadcast %48 : vector<4x8x1xf32> to vector<4x8x8xf32>
    %50 = arith.mulf %45, %49 : vector<4x8x8xf32>
    %c0_32 = arith.constant 0 : index
    %c0_33 = arith.constant 0 : index
    %c0_34 = arith.constant 0 : index
    %c0_35 = arith.constant 0 : index
    %51 = vector.load %arg15[%c0_32, %c0_33, %c0_34, %c0_35] : memref<1x4x8x8xf32, #tpu.memory_space<vmem>>, vector<1x4x8x8xf32>
    %52 = vector.shape_cast %51 : vector<1x4x8x8xf32> to vector<4x8x8xf32>
    %53 = vector.shape_cast %50 : vector<4x8x8xf32> to vector<1x4x8x8xf32>
    tpu.vector_store %arg15[%c0_32, %c0_33, %c0_34, %c0_35], %53 {strides = array<i32>} : memref<1x4x8x8xf32, #tpu.memory_space<vmem>>, vector<1x4x8x8xf32>,
    "tpu.trace_start"() <{level = 10 : i32, message = "hqk,hkd->hqd"}> : () -> ()
    %cst_36 = arith.constant dense<0.000000e+00> : vector<4x8x8xf32>
    %54 = tpu.matmul %50, %28, %cst_36 {dimension_numbers = #tpu.dot_dimension_numbers<[2], [1], [1], [2], [0, 0, 0, 1, 1, 2], [0], [0]>} : vector<4x8x8xf32>, vector<4x8x8xf32>, vector<4x8x8xf32> -> vector<4x8x8xf32>
    "tpu.trace_stop"() : () -> ()
    %55 = tpu.transpose %54, [1, 0, 2] : vector<4x8x8xf32> -> vector<8x4x8xf32>
    %56 = vector.shape_cast %55 : vector<8x4x8xf32> to vector<8x32xf32>
    %c0_37 = arith.constant 0 : index
    %c0_38 = arith.constant 0 : index
    %57 = vector.load %arg12[%c0_37, %c0_38] : memref<32x32xf32, #tpu.memory_space<vmem>>, vector<32x32xf32>
    %cst_39 = arith.constant dense<0.000000e+00> : vector<8x32xf32>
    %58 = tpu.matmul %56, %57, %cst_39 {dimension_numbers = #tpu.dot_dimension_numbers<[1], [0], [0], [1], [0, 0, 1, 1], [], []>} : vector<8x32xf32>, vector<32x32xf32>, vector<8x32xf32> -> vector<8x32xf32>
    %c0_40 = arith.constant 0 : index
    %c0_41 = arith.constant 0 : index
    %59 = vector.load %arg13[%c0_40, %c0_41] : memref<1x32xf32, #tpu.memory_space<vmem>>, vector<1x32xf32>
    %60 = vector.broadcast %59 : vector<1x32xf32> to vector<8x32xf32>
    %61 = arith.addf %58, %60 : vector<8x32xf32>
    %c0_42 = arith.constant 0 : index
    %c0_43 = arith.constant 0 : index
    %c0_44 = arith.constant 0 : index
    %62 = vector.load %arg14[%c0_42, %c0_43, %c0_44] : memref<1x8x32xf32, #tpu.memory_space<vmem>>, vector<1x8x32xf32>
    %63 = vector.shape_cast %62 : vector<1x8x32xf32> to vector<8x32xf32>
    %64 = vector.shape_cast %61 : vector<8x32xf32> to vector<1x8x32xf32>
    tpu.vector_store %arg14[%c0_42, %c0_43, %c0_44], %64 {strides = array<i32>} : memref<1x8x32xf32, #tpu.memory_space<vmem>>, vector<1x8x32xf32>,
    return
  }
  func.func @transform_0(%arg0: i32, %arg1: i32) -> (i32, i32, i32) {
    %c0_i32 = arith.constant 0 : i32
    %c0_i32_0 = arith.constant 0 : i32
    return %arg0, %arg1, %c0_i32 : i32, i32, i32
  }
  func.func @transform_1(%arg0: i32, %arg1: i32) -> (i32, i32, i32) {
    %c0_i32 = arith.constant 0 : i32
    %c0_i32_0 = arith.constant 0 : i32
    %c0_i32_1 = arith.constant 0 : i32
    return %arg0, %c0_i32, %c0_i32_0 : i32, i32, i32
  }
  func.func @transform_2(%arg0: i32, %arg1: i32) -> (i32, i32, i32) {
    %c0_i32 = arith.constant 0 : i32
    %c0_i32_0 = arith.constant 0 : i32
    %c0_i32_1 = arith.constant 0 : i32
    return %arg0, %c0_i32, %c0_i32_0 : i32, i32, i32
  }
  func.func @transform_3(%arg0: i32, %arg1: i32) -> (i32, i32, i32) {
    %c0_i32 = arith.constant 0 : i32
    %c0_i32_0 = arith.constant 0 : i32
    return %arg0, %arg1, %c0_i32 : i32, i32, i32
  }
  func.func @transform_4(%arg0: i32, %arg1: i32) -> (i32, i32) {
    %c0_i32 = arith.constant 0 : i32
    %c0_i32_0 = arith.constant 0 : i32
    %c0_i32_1 = arith.constant 0 : i32
    return %c0_i32, %c0_i32_0 : i32, i32
  }
  func.func @transform_5(%arg0: i32, %arg1: i32) -> (i32, i32) {
    %c0_i32 = arith.constant 0 : i32
    %c0_i32_0 = arith.constant 0 : i32
    %c0_i32_1 = arith.constant 0 : i32
    return %c0_i32, %c0_i32_0 : i32, i32
  }
  func.func @transform_6(%arg0: i32, %arg1: i32) -> (i32, i32) {
    %c0_i32 = arith.constant 0 : i32
    %c0_i32_0 = arith.constant 0 : i32
    %c0_i32_1 = arith.constant 0 : i32
    return %c0_i32, %c0_i32_0 : i32, i32
  }
  func.func @transform_7(%arg0: i32, %arg1: i32) -> (i32, i32) {
    %c0_i32 = arith.constant 0 : i32
    %c0_i32_0 = arith.constant 0 : i32
    %c0_i32_1 = arith.constant 0 : i32
    return %c0_i32, %c0_i32_0 : i32, i32
  }
  func.func @transform_8(%arg0: i32, %arg1: i32) -> (i32, i32) {
    %c0_i32 = arith.constant 0 : i32
    %c0_i32_0 = arith.constant 0 : i32
    %c0_i32_1 = arith.constant 0 : i32
    return %c0_i32, %c0_i32_0 : i32, i32
  }
  func.func @transform_9(%arg0: i32, %arg1: i32) -> (i32, i32) {
    %c0_i32 = arith.constant 0 : i32
    %c0_i32_0 = arith.constant 0 : i32
    %c0_i32_1 = arith.constant 0 : i32
    return %c0_i32, %c0_i32_0 : i32, i32
  }
  func.func @transform_10(%arg0: i32, %arg1: i32) -> (i32, i32) {
    %c0_i32 = arith.constant 0 : i32
    %c0_i32_0 = arith.constant 0 : i32
    %c0_i32_1 = arith.constant 0 : i32
    return %c0_i32, %c0_i32_0 : i32, i32
  }
  func.func @transform_11(%arg0: i32, %arg1: i32) -> (i32, i32) {
    %c0_i32 = arith.constant 0 : i32
    %c0_i32_0 = arith.constant 0 : i32
    %c0_i32_1 = arith.constant 0 : i32
    return %c0_i32, %c0_i32_0 : i32, i32
  }
  func.func @transform_12(%arg0: i32, %arg1: i32) -> (i32, i32, i32) {
    %c0_i32 = arith.constant 0 : i32
    %c0_i32_0 = arith.constant 0 : i32
    return %arg0, %arg1, %c0_i32 : i32, i32, i32
  }
  func.func @transform_13(%arg0: i32, %arg1: i32) -> (i32, i32, i32, i32) {
    %c0_i32 = arith.constant 0 : i32
    %c0_i32_0 = arith.constant 0 : i32
    %c0_i32_1 = arith.constant 0 : i32
    return %arg0, %c0_i32, %arg1, %c0_i32_0 : i32, i32, i32, i32
  }
}

</mosaic_0001>

<bundles_post_ra>
// kernel: tpu_custom_call.1
= control target key start
LH: loop header
LB: loop body
LE: loop exit
PB: predicated region body
PF: predicated region fallthrough
CT: control target
= control target key end

     0   :  { %s3859_s0 = inlined_call_operand.hbm [shape: f32[2,8,32], index: 0, kind: input, shape index: {}]   ;;  %s3860_s1 = inlined_call_operand.hbm [shape: f32[2,8,32], index: 1, kind: input, shape index: {}]   ;;  %s3861_s2 = inlined_call_operand.hbm [shape: f32[2,8,32], index: 2, kind: input, shape index: {}]   ;;  %s3862_s3 = inlined_call_operand.hbm [shape: f32[2,8,8], index: 3, kind: input, shape index: {}]   ;;  %s3863_s4 = inlined_call_operand.hbm [shape: f32[32,32], index: 4, kind: input, shape index: {}]   ;;  %s3864_s5 = inlined_call_operand.vmem [shape: f32[1,32], index: 5, kind: input, shape index: {}]   ;;  %s3865_s6 = inlined_call_operand.hbm [shape: f32[32,32], index: 6, kind: input, shape index: {}]   ;;  %s3866_s7 = inlined_call_operand.vmem [shape: f32[1,32], index: 7, kind: input, shape index: {}]   ;;  %s3867_s8 = inlined_call_operand.hbm [shape: f32[32,32], index: 8, kind: input, shape index: {}]   ;;  %s3868_s9 = inlined_call_operand.vmem [shape: f32[1,32], index: 9, kind: input, shape index: {}]   ;;  %s3869_s10 = inlined_call_operand.vmem [shape: f32[32,32], index: 10, kind: input, shape index: {}]   ;;  %s3870_s11 = inlined_call_operand.vmem [shape: f32[1,32], index: 11, kind: input, shape index: {}]   ;;  %s3871_s12 = inlined_call_operand.hbm [shape: f32[2,8,32], index: 12, kind: output, shape index: {0}]   ;;  %s3872_s13 = inlined_call_operand.hbm [shape: f32[2,4,8,8], index: 13, kind: output, shape index: {1}]  }
   0x1   :  { %3896 = sst [smem:[#allocation31_spill]] %s3859_s0 }
   0x2   :  { %3897 = sst [smem:[#allocation32_spill]] %s3860_s1 }
   0x3   :  { %3898 = sst [smem:[#allocation33_spill]] %s3863_s4 }
   0x4   :  { %3899 = sst [smem:[#allocation34_spill]] %s3865_s6 }
   0x5   :  { %3900 = sst [smem:[#allocation35_spill]] %s3868_s9 }
   0x6   :  { %3901 = sst [smem:[#allocation36_spill]] %s3869_s10 }
   0x7   :  { %3902 = sst [smem:[#allocation37_spill]] %s3870_s11 }
   0x8   :  { %3903 = sst [smem:[#allocation38_spill]] %s3871_s12 }
   0x9   :  { %3904 = sst [smem:[#allocation39_spill]] %s3872_s13 }
   0xa   :  { %19 = vsyncpa [#allocation3], 0 }
   0xb   :  { %21 = vsyncpa [#allocation3 + $0x1], 0 }
   0xc   :  { %22 = vsyncpa [#allocation6], 0 }
   0xd   :  { %24 = vsyncpa [#allocation6 + $0x1], 0 }
   0xe   :  { %25 = vsyncpa [#allocation9], 0 }
   0xf   :  { %27 = vsyncpa [#allocation9 + $0x1], 0 }
  0x10   :  { %28 = vsyncpa [#allocation12], 0 }
  0x11   :  { %29 = vsyncpa [#allocation4], 0 }
  0x12   :  { %31 = vsyncpa [#allocation4 + $0x1], 0 }
  0x13   :  { %32 = vsyncpa [#allocation16], 0 }
  0x14   :  { %34 = vsyncpa [#allocation16 + $0x1], 0  ;;  %s3248_s25 = smov 0   ;;  %s3250_s26 = smov 0  }
  0x15   :  { %s3252_s27 = smov 0   ;;  %s3254_s28 = smov 0  }
  0x16   :  { %s3256_s29 = smov 0   ;;  %s3258_s30 = smov 0  }
  0x17 LB: > { %3905 = sst [smem:[#allocation24_spill]] %s3133_s25  ;;  %s3279_s14 = sadd.s32 4294967295, %s3153_s30   ;;  %s3153_s30 = sphi %s3258_s30, %s40_s30   ;;  %s3149_s29 = sphi %s3256_s29, %s3954_s29   ;;  %s3145_s28 = sphi %s3254_s28, %s3953_s28   ;;  %s3141_s27 = sphi %s3252_s27, %s3957_s27   ;;  %s3137_s26 = sphi %s3250_s26, %s3956_s26   ;;  %s3133_s25 = sphi %s3248_s25, %s3955_s25  }
  0x18   : > { %3906 = sst [smem:[#allocation25_spill]] %s3145_s28  ;;  %s2472_s15 = sadd.s32 4294967294, %s3153_s30  }
  0x19   : > { %3907 = sst [smem:[#allocation26_spill]] %s3149_s29  ;;  %p74_p0 = scmp.ne.s32.totalorder %s3137_s26, %s3133_s25 }
  0x1a   : > { %p3876_p1 = scmp.eq.s32.totalorder %s3279_s14, 0  ;;  %p354_p3 = scmp.eq.s32.totalorder %s2472_s15, 1 }
  0x1b   : > { %p2473_p5 = scmp.ge.s32.totalorder %s3153_s30, 1  ;;  %p389_p7 = scmp.lt.s32.totalorder %s3153_s30, 3 }
  0x1c   : > { %p3288_p4 = por %p3876_p1, %p74_p0  ;;  %p3293_p6 = por %p354_p3, %p74_p0 }
  0x1d   : > { %p3298_p8 = pnand %p2473_p5, %p389_p7  ;;  %s3155_s19 = smov [#allocation10]  }
  0x1e   : > { %s3908_s16 = scalar_select %p3288_p4, 1, 0 }
  0x1f   : > { %s3909_s17 = scalar_select %p3293_p6, 1, 0 }
  0x20   : > { %s3911_s18 = scalar_select %p3298_p8, 1, 0 }
  0x21   : > { %3910 = sst [smem:[#allocation27_spill]] %s3909_s17  ;;  %s401_s20 = sshll.u32 %s3155_s19, 4  ;;  %s3302_s20 = int_to_ptr.vmem [resolvable:$true] %s401_s20 }
  0x22   : > { %p2700_p9 = pneg %p3298_p8  ;;  %s3156_s22 = smov [#allocation11]  }
  0x23   : > { %s417_s23 = sshll.u32 %s3156_s22, 4  ;;  %s3913_s4 = sld [smem:[#allocation33_spill]]  ;;  %s3313_s23 = int_to_ptr.vmem [resolvable:$true] %s417_s23 }
  0x24   : > { %p3309_p11 = pnand %p2700_p9, %p3876_p1 }
  0x26   : > { %s3912_s21 = scalar_select %p3309_p11, 1, 0 }
  0x27   : > { %p3323_p13 = pneg %p3309_p11 }
  0x29   : > { %s2819_s17 = scalar_lea.hbm %s3913_s4, 512 }
  0x2a   : > { %p2820_p12 = scmp.ne.s32.totalorder %s3913_s4, %s2819_s17  ;;  %p2826_p5 = scmp.lt.u32.totalorder %s2819_s17, %s3913_s4 }
  0x2b   : > { %s3914_s12 = scalar_select %p3323_p13, 1, 0 }
  0x2c   : > { %p2822_p0 = pnand %p3323_p13, %p2820_p12 }
  0x2e   : > { %p2823_p3 = pneg %p2822_p0 }
  0x30   : > { %p2828_p7 = pnand %p2826_p5, %p2823_p3 }
  0x32   : > { %2831 = shalt.err (!%p2828_p7)
}
  0x33   : > { %s2832_s25 = scalar_lea.vmem %s3302_s20, 512  ;;  %p2840_p2 = scmp.lt.s32.totalorder %s3302_s20, %s3302_s20 }
  0x34   : > { %p2833_p9 = scmp.ne.s32.totalorder %s3302_s20, %s2832_s25  ;;  %p2841_p6 = scmp.lt.s32.totalorder %s2832_s25, %s2832_s25 }
  0x36   : > { %p2835_p10 = pnand %p2833_p9, %p3323_p13  ;;  %p2842_p12 = por %p2841_p6, %p2840_p2 }
  0x38   : > { %p2836_p1 = pneg %p2835_p10 }
  0x3a   : > { %p2843_p0 = pnand %p2842_p12, %p2836_p1 }
  0x3c   : > { %2846 = shalt.err (!%p2843_p0)
}
  0x3d   : > { %s3880_s24 = smov 128   ;;  %s3881_s11 = smov 8  }
  0x3e   : > { %2703 = dma.hbm_to_vmem [thread:$0]  (!%p3309_p11), %s3913_s4, 512, %s3302_s20, [#allocation9], %s3880_s24, %s3880_s24, %s3881_s11  }
  0x3f   : > { %s3915_s6 = sld [smem:[#allocation34_spill]] }
  0x45   : > { %s2847_s25 = scalar_lea.hbm %s3915_s6, 512 }
  0x46   : > { %p2848_p1 = scmp.ne.s32.totalorder %s3915_s6, %s2847_s25  ;;  %p2854_p10 = scmp.lt.u32.totalorder %s2847_s25, %s3915_s6 }
  0x48   : > { %p2850_p2 = pnand %p2848_p1, %p3323_p13 }
  0x4a   : > { %p2851_p6 = pneg %p2850_p2 }
  0x4c   : > { %p2856_p3 = pnand %p2854_p10, %p2851_p6 }
  0x4e   : > { %2859 = shalt.err (!%p2856_p3)
}
  0x4f   : > { %s2860_s20 = scalar_lea.vmem %s3313_s23, 512  ;;  %p2868_p12 = scmp.lt.s32.totalorder %s3313_s23, %s3313_s23 }
  0x50   : > { %p2861_p5 = scmp.ne.s32.totalorder %s3313_s23, %s2860_s20  ;;  %p2869_p0 = scmp.lt.s32.totalorder %s2860_s20, %s2860_s20 }
  0x52   : > { %p2863_p7 = pnand %p2861_p5, %p3323_p13  ;;  %p2870_p1 = por %p2869_p0, %p2868_p12 }
  0x54   : > { %p2864_p9 = pneg %p2863_p7 }
  0x56   : > { %p2871_p2 = pnand %p2870_p1, %p2864_p9 }
  0x58   : > { %2874 = shalt.err (!%p2871_p2)
}
  0x59   : > { %2706 = dma.hbm_to_vmem [thread:$0]  (!%p3309_p11), %s3915_s6, 512, %s3313_s23, [#allocation12], %s3880_s24, %s3880_s24, %s3881_s11  }
  0x5a   : > { %s52_s13 = sadd.s32 1, %s3149_s29  ;;  %s61_s28 = sadd.s32 1, %s3141_s27 }
  0x5b   : > { %p54_p6 = scmp.ge.s32.totalorder %s52_s13, 2  ;;  %p68_p10 = scmp.ne.s32.totalorder %s3141_s27, %s3137_s26 }
  0x5c   : > { %p69_p3 = scmp.eq.s32.totalorder %s3153_s30, 0  ;;  %p2733_p5 = scmp.lt.s32.totalorder %s3153_s30, 2 }
  0x5d   : > { %s3959_s13 = smov (%p54_p6, %s52_s13), 0  ;;  %p3917_p9 = scmp.eq.s32.totalorder %s3279_s14, 1 }
  0x5e   : > { %3916 = sst [smem:[#allocation28_spill]] %s3959_s13  ;;  %p70_p7 = por %p69_p3, %p68_p10 }
  0x5f   : > { %p3383_p12 = por %p3917_p9, %p68_p10  ;;  %s56_s15 = ssub.s32 %s3149_s29, %s3959_s13 }
  0x60   : > { %s3882_s23 = sand.u32 1, %s3141_s27   ;;  %p59_p0 = scmp.eq.s32.totalorder %s56_s15, 0 }
  0x61   : > { %s3918_s17 = scalar_select %p3383_p12, 1, 0 }
  0x62   : > { %s3392_s19 = sshll.u32 %s3882_s23, 3  ;;  %s3395_s22 = sshll.u32 %s3149_s29, 7 }
  0x63   : > { %3919 = sst [smem:[#allocation29_spill]] %s3918_s17  ;;  %p3397_p1 = pnand %p2733_p5, %p70_p7 }
  0x64   : > { %s3402_s20 = scalar_select %p59_p0, %s3141_s27, %s61_s28  }
  0x65   : > { %s3920_s25 = scalar_select %p3397_p1, 1, 0 }
  0x66   : > { %3921 = sst [smem:[#allocation30_spill]] %s3402_s20  ;;  %s3887_s9 = sand.u32 1, %s3153_s30  }
  0x67   : > { %s3922_s1 = sld [smem:[#allocation32_spill]]  ;;  %s479_s15 = scalar_lea.vmem [#allocation5], %s3392_s19 }
  0x68   : > { %s486_s23 = sshll.u32 %s479_s15, 4  ;;  %s3416_s4 = scalar_lea.sflag [#allocation6], %s3887_s9  ;;  %s3412_s23 = int_to_ptr.vmem [resolvable:$true] %s486_s23 }
  0x69   : > { %p3422_p6 = pneg %p3397_p1 }
  0x6d   : > { %s3409_s11 = scalar_lea.hbm %s3922_s1, %s3395_s22  ;;  %s2880_s15 = scalar_lea.hbm %s3922_s1, 256 }
  0x6e   : > { %s2875_s6 = scalar_lea.hbm %s3409_s11, 128  ;;  %p2881_p5 = scmp.lt.u32.totalorder %s3409_s11, %s3922_s1 }
  0x6f   : > { %p2876_p2 = scmp.ne.s32.totalorder %s3409_s11, %s2875_s6  ;;  %p2882_p7 = scmp.lt.u32.totalorder %s2880_s15, %s2875_s6 }
  0x70   : > { %p2884_p0 = scmp.lt.u32.totalorder %s2875_s6, %s3409_s11 }
  0x71   : > { %p2878_p10 = pnand %p3422_p6, %p2876_p2  ;;  %p2883_p9 = por %p2882_p7, %p2881_p5 }
  0x73   : > { %p2879_p3 = pneg %p2878_p10  ;;  %p2885_p12 = por %p2884_p0, %p2883_p9 }
  0x75   : > { %p2886_p4 = pnand %p2885_p12, %p2879_p3 }
  0x77   : > { %2889 = shalt.err (!%p2886_p4)
}
  0x78   : > { %s2890_s9 = scalar_lea.vmem %s3412_s23, 128  ;;  %s3159_s24 = smov [#allocation5]  }
  0x79   : > { %p2891_p2 = scmp.ne.s32.totalorder %s3412_s23, %s2890_s9  ;;  %s2895_s10 = sshll.u32 %s3159_s24, 4  ;;  %s2896_s10 = int_to_ptr.vmem [resolvable:$false] %s2895_s10 }
  0x7a   : > { %s2897_s29 = scalar_lea.vmem %s2896_s10, 256  ;;  %p2898_p11 = scmp.lt.s32.totalorder %s3412_s23, %s2896_s10 }
  0x7b   : > { %p2893_p10 = pnand %p2891_p2, %p3422_p6  ;;  %p2899_p13 = scmp.lt.s32.totalorder %s2897_s29, %s2890_s9 }
  0x7d   : > { %p2894_p8 = pneg %p2893_p10  ;;  %p2900_p5 = por %p2899_p13, %p2898_p11 }
  0x7f   : > { %p2901_p7 = pnand %p2900_p5, %p2894_p8 }
  0x81   : > { %2904 = shalt.err (!%p2901_p7)
}
  0x82   : > { %2716 = dma.hbm_to_vmem [thread:$0]  (!%p3397_p1), %s3409_s11, 128, %s3412_s23, %s3416_s4  }
  0x83   : > { %s3160_s6 = smov [#allocation13]   ;;  %s3924_s0 = sld [smem:[#allocation31_spill]] }
  0x84   : > { %s433_s13 = sshll.u32 %s3160_s6, 4  ;;  %s2905_s29 = scalar_lea.hbm %s3867_s8, 512  ;;  %s434_s13 = int_to_ptr.vmem [resolvable:$true] %s433_s13 }
  0x85   : > { %p2906_p4 = scmp.ne.s32.totalorder %s3867_s8, %s2905_s29  ;;  %p3925_p8 = scmp.ne.s32.totalorder %s3914_s12, 0 }
  0x86   : > { %p2912_p12 = scmp.lt.u32.totalorder %s2905_s29, %s3867_s8 }
  0x87   : > { %p2908_p11 = pnand %p2906_p4, %p3925_p8 }
  0x89   : > { %s3450_s1 = scalar_lea.hbm %s3924_s0, %s3395_s22  ;;  %p2909_p13 = pneg %p2908_p11 }
  0x8b   : > { %p2914_p3 = pnand %p2912_p12, %p2909_p13 }
  0x8d   : > { %2917 = shalt.err (!%p2914_p3)
}
  0x8e   : > { %s2918_s6 = scalar_lea.vmem %s434_s13, 512  ;;  %p2926_p10 = scmp.lt.s32.totalorder %s434_s13, %s434_s13 }
  0x8f   : > { %p2919_p9 = scmp.ne.s32.totalorder %s434_s13, %s2918_s6  ;;  %p2927_p5 = scmp.lt.s32.totalorder %s2918_s6, %s2918_s6 }
  0x91   : > { %p2921_p0 = pnand %p2919_p9, %p3925_p8  ;;  %p2928_p7 = por %p2927_p5, %p2926_p10 }
  0x93   : > { %p2922_p2 = pneg %p2921_p0 }
  0x95   : > { %p2929_p1 = pnand %p2928_p7, %p2922_p2 }
  0x97   : > { %2932 = shalt.err (!%p2929_p1)
}
  0x98   : > { %p3926_p4 = scmp.ne.s32.totalorder %s3912_s21, 0  ;;  %s3927_s17 = smov 8  }
  0x99   : > { %s3928_s20 = smov 128   ;;  %s460_s12 = scalar_lea.vmem [#allocation2], %s3392_s19 }
  0x9a   : > { %2709 = dma.hbm_to_vmem [thread:$0]  (!%p3926_p4), %s3867_s8, 512, %s434_s13, [#allocation12], %s3928_s20, %s3928_s20, %s3927_s17  }
  0x9b   : > { %s468_s9 = sshll.u32 %s460_s12, 4  ;;  %s3480_s29 = scalar_lea.hbm %s3861_s2, %s3395_s22  ;;  %s3474_s9 = int_to_ptr.vmem [resolvable:$true] %s468_s9 }
  0x9c   : > { %s3929_s11 = sand.u32 1, %s3141_s27   ;;  %s2933_s6 = scalar_lea.hbm %s3450_s1, 128 }
  0x9d   : > { %s457_s23 = scalar_lea.sflag [#allocation3], %s3929_s11  ;;  %p2934_p1 = scmp.ne.s32.totalorder %s3450_s1, %s2933_s6 }
  0x9e   : > { %s2938_s13 = scalar_lea.hbm %s3924_s0, 256  ;;  %p2939_p13 = scmp.lt.u32.totalorder %s3450_s1, %s3924_s0 }
  0x9f   : > { %p2936_p8 = pnand %p2934_p1, %p3422_p6  ;;  %p2940_p12 = scmp.lt.u32.totalorder %s2938_s13, %s2933_s6 }
  0xa0   : > { %p2942_p9 = scmp.lt.u32.totalorder %s2933_s6, %s3450_s1 }
  0xa1   : > { %p2937_p11 = pneg %p2936_p8  ;;  %p2941_p3 = por %p2940_p12, %p2939_p13 }
  0xa3   : > { %p2943_p0 = por %p2942_p9, %p2941_p3 }
  0xa5   : > { %p2944_p2 = pnand %p2943_p0, %p2937_p11 }
  0xa7   : > { %2947 = shalt.err (!%p2944_p2)
}
  0xa8   : > { %s2948_s12 = scalar_lea.vmem %s3474_s9, 128  ;;  %s3161_s21 = smov [#allocation2]  }
  0xa9   : > { %p2949_p10 = scmp.ne.s32.totalorder %s3474_s9, %s2948_s12  ;;  %s2953_s10 = sshll.u32 %s3161_s21, 4  ;;  %s2954_s10 = int_to_ptr.vmem [resolvable:$false] %s2953_s10 }
  0xaa   : > { %s2955_s11 = scalar_lea.vmem %s2954_s10, 256  ;;  %p2956_p4 = scmp.lt.s32.totalorder %s3474_s9, %s2954_s10 }
  0xab   : > { %p2951_p5 = pnand %p2949_p10, %p3422_p6  ;;  %p2957_p1 = scmp.lt.s32.totalorder %s2955_s11, %s2948_s12 }
  0xad   : > { %p2952_p7 = pneg %p2951_p5  ;;  %p2958_p8 = por %p2957_p1, %p2956_p4 }
  0xaf   : > { %p2959_p13 = pnand %p2958_p8, %p2952_p7 }
  0xb1   : > { %2962 = shalt.err (!%p2959_p13)
}
  0xb2   : > { %p3930_p11 = scmp.ne.s32.totalorder %s3920_s25, 0  ;;  %s497_s6 = scalar_lea.vmem [#allocation7], %s3392_s19 }
  0xb3   : > { %s504_s15 = sshll.u32 %s497_s6, 4  ;;  %s3510_s17 = scalar_lea.hbm %s3862_s3, %s3395_s22  ;;  %s505_s15 = int_to_ptr.vmem [resolvable:$true] %s504_s15 }
  0xb4   : > { %2713 = dma.hbm_to_vmem [thread:$0]  (!%p3930_p11), %s3450_s1, 128, %s3474_s9, %s457_s23  }
  0xb5   : > { %s2963_s20 = scalar_lea.hbm %s3480_s29, 128  ;;  %s2968_s10 = scalar_lea.hbm %s3861_s2, 256 }
  0xb6   : > { %p2964_p12 = scmp.ne.s32.totalorder %s3480_s29, %s2963_s20  ;;  %p2969_p0 = scmp.lt.u32.totalorder %s3480_s29, %s3861_s2 }
  0xb7   : > { %p2970_p2 = scmp.lt.u32.totalorder %s2968_s10, %s2963_s20  ;;  %p2972_p5 = scmp.lt.u32.totalorder %s2963_s20, %s3480_s29 }
  0xb8   : > { %p2966_p3 = pnand %p2964_p12, %p3422_p6 }
  0xb9   : > { %p2971_p10 = por %p2970_p2, %p2969_p0 }
  0xba   : > { %p2967_p9 = pneg %p2966_p3 }
  0xbb   : > { %p2973_p7 = por %p2972_p5, %p2971_p10 }
  0xbd   : > { %p2974_p4 = pnand %p2973_p7, %p2967_p9 }
  0xbf   : > { %2977 = shalt.err (!%p2974_p4)
}
  0xc0   : > { %s2978_s1 = scalar_lea.vmem %s505_s15, 128  ;;  %s3162_s22 = smov [#allocation7]  }
  0xc1   : > { %p2979_p1 = scmp.ne.s32.totalorder %s505_s15, %s2978_s1  ;;  %s2983_s9 = sshll.u32 %s3162_s22, 4  ;;  %s2984_s9 = int_to_ptr.vmem [resolvable:$false] %s2983_s9 }
  0xc2   : > { %s2985_s23 = scalar_lea.vmem %s2984_s9, 256  ;;  %p2986_p12 = scmp.lt.s32.totalorder %s505_s15, %s2984_s9 }
  0xc3   : > { %p2981_p8 = pnand %p2979_p1, %p3422_p6  ;;  %p2987_p3 = scmp.lt.s32.totalorder %s2985_s23, %s2978_s1 }
  0xc5   : > { %p2982_p13 = pneg %p2981_p8  ;;  %p2988_p11 = por %p2987_p3, %p2986_p12 }
  0xc7   : > { %p2989_p0 = pnand %p2988_p11, %p2982_p13 }
  0xc9   : > { %2992 = shalt.err (!%p2989_p0)
}
  0xca   : > { %p3931_p2 = scmp.ne.s32.totalorder %s3920_s25, 0  ;;  %s515_s0 = scalar_lea.vmem [#allocation8], %s3392_s19 }
  0xcb   : > { %s523_s6 = sshll.u32 %s515_s0, 4  ;;  %s3932_s24 = sand.u32 1, %s3153_s30   ;;  %s524_s6 = int_to_ptr.vmem [resolvable:$true] %s523_s6 }
  0xcc   : > { %2719 = dma.hbm_to_vmem [thread:$0]  (!%p3931_p2), %s3480_s29, 128, %s505_s15, %s3416_s4  }
  0xcd   : > { %s512_s13 = scalar_lea.sflag [#allocation9], %s3932_s24  ;;  %s2993_s20 = scalar_lea.hbm %s3510_s17, 128 }
  0xce   : > { %p2994_p11 = scmp.ne.s32.totalorder %s3510_s17, %s2993_s20  ;;  %s2998_s10 = scalar_lea.hbm %s3862_s3, 256 }
  0xcf   : > { %p2999_p5 = scmp.lt.u32.totalorder %s3510_s17, %s3862_s3  ;;  %p3000_p7 = scmp.lt.u32.totalorder %s2998_s10, %s2993_s20 }
  0xd0   : > { %p2996_p9 = pnand %p2994_p11, %p3422_p6  ;;  %p3002_p1 = scmp.lt.u32.totalorder %s2993_s20, %s3510_s17 }
  0xd1   : > { %p3001_p4 = por %p3000_p7, %p2999_p5 }
  0xd2   : > { %p2997_p10 = pneg %p2996_p9 }
  0xd3   : > { %p3003_p8 = por %p3002_p1, %p3001_p4 }
  0xd5   : > { %p3004_p13 = pnand %p3003_p8, %p2997_p10 }
  0xd7   : > { %3007 = shalt.err (!%p3004_p13)
}
  0xd8   : > { %s3008_s4 = scalar_lea.vmem %s524_s6, 128  ;;  %s3163_s19 = smov [#allocation8]  }
  0xd9   : > { %p3009_p12 = scmp.ne.s32.totalorder %s524_s6, %s3008_s4  ;;  %s3013_s29 = sshll.u32 %s3163_s19, 4  ;;  %s3014_s29 = int_to_ptr.vmem [resolvable:$false] %s3013_s29 }
  0xda   : > { %s3015_s15 = scalar_lea.vmem %s3014_s29, 256  ;;  %p3016_p11 = scmp.lt.s32.totalorder %s524_s6, %s3014_s29 }
  0xdb   : > { %p3011_p3 = pnand %p3009_p12, %p3422_p6  ;;  %p3017_p9 = scmp.lt.s32.totalorder %s3015_s15, %s3008_s4 }
  0xdd   : > { %p3012_p0 = pneg %p3011_p3  ;;  %p3018_p2 = por %p3017_p9, %p3016_p11 }
  0xdf   : > { %p3019_p5 = pnand %p3018_p2, %p3012_p0 }
  0xe1   : > { %3022 = shalt.err (!%p3019_p5)
}
  0xe2   : > { %p3933_p7 = scmp.ne.s32.totalorder %s3920_s25, 0  ;;  %p3934_p10 = scmp.ne.s32.totalorder %s3911_s18, 0 }
  0xe3   : > { %s3553_s28 = sand.u32 (!%p3934_p10), 1, %s3137_s26   ;;  %p3935_p6 = scmp.ne.s32.totalorder (!%p3934_p10), %s3908_s16, 0 }
  0xe4   : > { %2722 = dma.hbm_to_vmem [thread:$0]  (!%p3933_p7), %s3510_s17, 128, %s524_s6, %s512_s13  }
  0xe5   : > { %532 = sbr.rel (%p3934_p10) target bundleno = 1749 (0x6d5), region = 68  ;;  %s3556_s22 = sshll.u32 (!%p3934_p10), %s3553_s28, 3 }
  0xe6   : > { %s535_s9 = scalar_lea.sflag (!%p3934_p10), [#allocation3], %s3553_s28  ;;  %s538_s23 = scalar_lea.vmem (!%p3934_p10), [#allocation2], %s3556_s22 }
  0xec   : > { %3104 = dma.done.wait (%p3935_p6), %s535_s9, 128  }
  0xed   : > { %3106 = vsyncadd (%p3935_p6), %s535_s9, 4294967168  ;;  %s543_s18 = sand.u32 1, %s3279_s14   ;;  %s547_s17 = scalar_lea.vmem [#allocation5], %s3556_s22 }
  0xee   : > { %s544_s25 = scalar_lea.sflag [#allocation6], %s543_s18 }
  0xef   : > { %3108 = dma.done.wait (%p3935_p6), %s544_s25, 256  }
  0xf0   : > { %3110 = vsyncadd (%p3935_p6), %s544_s25, 4294967040  ;;  %s556_s0 = scalar_lea.vmem [#allocation7], %s3556_s22  ;;  %s562_s6 = scalar_lea.sflag [#allocation9], %s543_s18 }
  0xf1   : > { %s565_s24 = scalar_lea.vmem [#allocation8], %s3556_s22 }
  0xf2   : > { %3112 = dma.done.wait (%p3935_p6), %s562_s6, 128  }
  0xf3   : > { %3114 = vsyncadd (%p3935_p6), %s562_s6, 4294967168  ;;  %p3936_p2 = scmp.eq.s32.totalorder %s3279_s14, 0 }
  0xf5   : > { %3116 = dma.done.wait (%p3936_p2), [#allocation9], 512   ;;  %p3937_p4 = pmov %p3936_p2 }
  0xf6   : > { %p3938_p1 = pmov %p3936_p2 }
  0xf7   : > { %3118 = vsyncadd (%p3937_p4), [#allocation9], 4294966784 }
  0xf8   : > { %3120 = dma.done.wait (%p3938_p1), [#allocation12], 1024   ;;  %p3939_p8 = pmov %p3938_p1 }
  0xf9   : > { %v3164_v0 = vmov 0.0|0.0   ;;  %vm3165_vm0 = vmmov 0   ;;  %v3166_v1 = vmov 0.0   ;;  %v729_v2 = vld [vmem:[#allocation11] sm:$0xff]  ;;  %v730_v3 = vld [vmem:[#allocation11 + $0x8] sm:$0xff]  ;;  %v731_v7 = vld [vmem:[#allocation11 + $0x10] sm:$0xff]  ;;  %v912_v33 = vlaneseq }
  0xfa   : > { %3122 = vsyncadd (%p3939_p8), [#allocation12], 4294966272  ;;  %2658 = vmatprep.subr.bf16.mxu1 %v3164_v0  ;;  %2652 = vmatprep.subr.bf16.mxu0 %v3164_v0  ;;  %v644_v4 = vld [vmem:[#allocation10] sm:$0xff]  ;;  %v2659_v5 = vpack.c.bf16 %v730_v3, %v729_v2  ;;  %v645_v6 = vld [vmem:[#allocation10 + $0x8] sm:$0xff]  ;;  %vm655_vm1 = vcmask 261120   ;;  %s3167_s12 = smov 104  }
  0xfb   : > { %2587 = vmatprep.mubr.msk.f32.mxu1 %vm3165_vm0, %v3166_v1  ;;  %2576 = vmatprep.mubr.msk.f32.mxu0 %vm3165_vm0, %v3166_v1  ;;  %v732_v8 = vld [vmem:[#allocation11 + $0x18] sm:$0xff]  ;;  %v2653_v9 = vpack.c.bf16 %v645_v6, %v644_v4  ;;  %v646_v10 = vld [vmem:[#allocation10 + $0x10] sm:$0xff]  ;;  %v640_v15 = vld [vmem:[%s538_s23] sm:$0xff]  ;;  %s3168_s21 = smov 120   ;;  %s3169_s10 = smov 112   ;;  %v913_v37 = vshrl.u32 %v912_v33, 7 }
  0xfc   : > { %v647_v11 = vld [vmem:[#allocation10 + $0x18] sm:$0xff]  ;;  %2660 = vmatpush3.bf16.msra.mxu1 %v2659_v5  ;;  %v2662_v12 = vpack.c.bf16 %v732_v8, %v731_v7  ;;  %v2498_v16 = vld [vmem:[%s3866_s7] ss:$0 sm:$0xff]  ;;  %v814_v25 = vld [vmem:[#allocation13 + $0x8] sm:$0xff]  ;;  %v3170_v31 = vmov 1983009808  }
  0xfd   : > { %2654 = vmatpush3.bf16.msra.mxu0 %v2653_v9  ;;  %2661 = vmatprep.subr.bf16.mxu1 %v3164_v0  ;;  %v2656_v13 = vpack.c.bf16 %v647_v11, %v646_v10  ;;  %v641_v14 = vld [vmem:[%s547_s17] sm:$0xff]  ;;  %v2496_v18 = vld [vmem:[%s3864_s5] ss:$0 sm:$0xff]  ;;  %v910_v32 = vunpack.c.l.s4 %v3170_v31  ;;  %v3171_v34 = vmov 1934713408   ;;  %vm1338_vm2 = vcmask 64512  }
  0xfe   : > { %2655 = vmatprep.subr.bf16.mxu0 %v3164_v0  ;;  %v813_v24 = vld [vmem:[#allocation13] sm:$0xff]  ;;  %v815_v26 = vld [vmem:[#allocation13 + $0x10] sm:$0xff]  ;;  %v816_v28 = vld [vmem:[#allocation13 + $0x18] sm:$0xff]  ;;  %v942_v35 = vunpack.c.l.s4 %v3171_v34  ;;  %s3940_s4 = sld [smem:[#allocation35_spill]]  ;;  %s2495_s19 = sshll.u32 %s3553_s28, 5  ;;  %vm2136_vm4 = vcmask 130048  }
  0xff   : > { %v2665_v27 = vpack.c.bf16 %v814_v25, %v813_v24  ;;  %v2668_v29 = vpack.c.bf16 %v816_v28, %v815_v26  ;;  %v642_v30 = vld [vmem:[%s556_s0] sm:$0xff]  ;;  %v911_v36 = vunpack.c.0.s8 %v910_v32  ;;  %s3696_s29 = scalar_lea.vmem [#allocation15], %s2495_s19  ;;  %s3941_s23 = sld [smem:[#allocation36_spill]]  ;;  %vm2138_vm5 = vcmask 195584  }
 0x100   : > { %2663 = vmatpush3.bf16.msra.mxu1 %v2662_v12  ;;  %v943_v40 = vunpack.c.0.s8 %v942_v35  ;;  %s3942_s14 = sld [smem:[#allocation25_spill]]  ;;  %s3172_s16 = smov 16  }
 0x101   : > { %2657 = vmatpush3.bf16.msra.mxu0 %v2656_v13  ;;  %2601 = vmatprep.subr.mxu1 %v3166_v1  ;;  %v3623_v41 = vsub.s32 %v911_v36, %v913_v37  ;;  %s3173_s13 = smov 8   ;;  %s3174_s20 = smov 24  }
 0x102   : > { %2664 = vmatprep.subr.bf16.mxu0 %v3164_v0  ;;  %v3625_v48 = vsub.s32 %v943_v40, %v913_v37  ;;  %s2231_s15 = scalar_lea.sflag [#allocation16], %s3553_s28  ;;  %s3175_s18 = smov [#allocation15]  }
 0x103   : > { %2588 = vmatmul.mubr.msk.f32.vlgmr.msra.gmra.mrb[0].mxu1 %vm655_vm1, %v641_v14  ;;  %s3027_s25 = sshll.u32 %s3175_s18, 4  ;;  %s3028_s25 = int_to_ptr.vmem [resolvable:$false] %s3027_s25 }
 0x104   : > { %2577 = vmatmul.mubr.msk.f32.vlgmr.msra.gmra.mrb[0].mxu0 %vm655_vm1, %v640_v15  ;;  %2603 = vmatprep.mubr.msk.f32.mxu1 %vm3165_vm0, %v3166_v1 }
 0x105   : > { %2598 = vmatprep.mubr.msk.f32.mxu0 %vm3165_vm0, %v3166_v1  ;;  %2666 = vmatpush3.bf16.msra.mxu0 %v2665_v27 }
 0x106   : > { %2667 = vmatprep.subr.bf16.mxu0 %v3164_v0 }
 0x109   : > { %2669 = vmatpush3.bf16.msra.mxu0 %v2668_v29 }
 0x10a   : > { %2621 = vmatprep.subr.mxu0 %v3166_v1 }
 0x10c   : > { %2599 = vmatmul.mubr.msk.f32.vlgmr.msra.gmra.mrb[2].mxu0 %vm655_vm1, %v642_v30 }
 0x10d   : > { %2623 = vmatprep.mubr.msk.f32.mxu0 %vm3165_vm0, %v3166_v1 }
 0x1d6   : > { %v809_v17 = vpop.f32.mrb[0].mxu1 }
 0x1d7   : > { %v810_v19 = vadd.f32 %v2498_v16, %v809_v17  ;;  %v2589_v20 = vpop.f32.mrb[1].mxu1  ;;  %v725_v21 = vpop.f32.mrb[0].mxu0 }
 0x1d8   : > { %v2578_v22 = vpop.f32.mrb[1].mxu0  ;;  %v726_v23 = vadd.f32 %v2496_v18, %v725_v21 }
 0x1d9   : > { %1050 = vrot.lane.b32.xlu1 %v810_v19, %s3167_s12  ;;  %1044 = vrot.lane.b32.xlu0 %v810_v19, %s3168_s21 }
 0x1dd   : > { %1047 = vrot.lane.b32.xlu0 %v810_v19, %s3169_s10  ;;  %898 = vrot.lane.b32.xlu1 %v726_v23, %s3168_s21 }
 0x1e1   : > { %901 = vrot.lane.b32.xlu0 %v726_v23, %s3169_s10  ;;  %904 = vrot.lane.b32.xlu1 %v726_v23, %s3167_s12 }
 0x24b   : > { %v1051_v38 = vpop.permute.xlu1 %1050  ;;  %v1045_v39 = vpop.permute.xlu0 %1044 }
 0x24c   : > { %v1069_v42 = vcombine.low %v1045_v39, %v1051_v38  ;;  %v1070_v43 = vcombine.high %v1045_v39, %v1051_v38 }
 0x24e   : > { %v1077_v49 = vrot.slane %v1069_v42, %v3623_v41  ;;  %v1084_v50 = vrot.slane %v1070_v43, %v3623_v41 }
 0x24f   : > { %v1048_v44 = vpop.permute.xlu0 %1047  ;;  %v899_v45 = vpop.permute.xlu1 %898 }
 0x250   : > { %v1053_v46 = vcombine.low %v810_v19, %v1048_v44  ;;  %v1054_v47 = vcombine.high %v810_v19, %v1048_v44 }
 0x252   : > { %v1061_v51 = vrot.slane %v1053_v46, %v3623_v41  ;;  %v1068_v52 = vrot.slane %v1054_v47, %v3623_v41 }
 0x253   : > { %v902_v53 = vpop.permute.xlu0 %901  ;;  %v905_v54 = vpop.permute.xlu1 %904 }
 0x254   : > { %v1085_v55 = vcombine.low %v1061_v51, %v1077_v49  ;;  %v1086_v56 = vcombine.high %v1061_v51, %v1077_v49  ;;  %v1101_v57 = vcombine.low %v1068_v52, %v1084_v50  ;;  %v1102_v58 = vcombine.high %v1068_v52, %v1084_v50 }
 0x255   : > { %v907_v59 = vcombine.low %v726_v23, %v902_v53  ;;  %v908_v60 = vcombine.high %v726_v23, %v902_v53  ;;  %v923_v61 = vcombine.low %v899_v45, %v905_v54  ;;  %v924_v62 = vcombine.high %v899_v45, %v905_v54 }
 0x256   : > { %v1093_v63 = vrot.slane %v1085_v55, %v3625_v48  ;;  %v1100_v2 = vrot.slane %v1086_v56, %v3625_v48  ;;  %v1109_v3 = vrot.slane %v1101_v57, %v3625_v48  ;;  %v1116_v4 = vrot.slane %v1102_v58, %v3625_v48 }
 0x257   : > { %v915_v5 = vrot.slane %v907_v59, %v3623_v41  ;;  %v922_v6 = vrot.slane %v908_v60, %v3623_v41  ;;  %v931_v7 = vrot.slane %v923_v61, %v3623_v41  ;;  %v938_v8 = vrot.slane %v924_v62, %v3623_v41  ;;  %v893_v59 = vpop.f32.mrb[2].mxu0  ;;  %v643_v61 = vld [vmem:[%s565_s24] sm:$0xff] }
 0x258   : > { %v1121_v9 = vcombine.low %v1093_v63, %v1100_v2  ;;  %v2504_v10 = vcombine.high %v1093_v63, %v1100_v2  ;;  %v1137_v11 = vcombine.low %v1109_v3, %v1116_v4  ;;  %v2505_v12 = vcombine.high %v1109_v3, %v1116_v4  ;;  %v2600_v60 = vpop.f32.mrb[3].mxu0 }
 0x259   : > { %v939_v13 = vcombine.low %v915_v5, %v931_v7  ;;  %v940_v14 = vcombine.high %v915_v5, %v931_v7  ;;  %v955_v15 = vcombine.low %v922_v6, %v938_v8  ;;  %v956_v16 = vcombine.high %v922_v6, %v938_v8 }
 0x25a   : > { %v1128_v17 = vrot.slane %v1121_v9, %v3623_v41  ;;  %v1136_v18 = vrot.slane %v2504_v10, %v3623_v41  ;;  %v1144_v19 = vrot.slane %v1137_v11, %v3623_v41  ;;  %v1152_v20 = vrot.slane %v2505_v12, %v3623_v41 }
 0x25b   : > { %v947_v21 = vrot.slane %v939_v13, %v3625_v48  ;;  %v954_v22 = vrot.slane %v940_v14, %v3625_v48  ;;  %v963_v23 = vrot.slane %v955_v15, %v3625_v48  ;;  %v970_v24 = vrot.slane %v956_v16, %v3625_v48 }
 0x25c   : > { %v1153_v25 = vcombine.low %v1128_v17, %v1136_v18  ;;  %v1169_v26 = vcombine.low %v1144_v19, %v1152_v20  ;;  %v1154_v40 = vcombine.high %v1128_v17, %v1136_v18  ;;  %v1170_v42 = vcombine.high %v1144_v19, %v1152_v20 }
 0x25d   : > { %v975_v27 = vcombine.low %v947_v21, %v954_v22  ;;  %v2502_v28 = vcombine.high %v947_v21, %v954_v22  ;;  %v991_v29 = vcombine.low %v963_v23, %v970_v24  ;;  %v2503_v30 = vcombine.high %v963_v23, %v970_v24  ;;  %v2500_v22 = vld [vmem:[%s3940_s4] ss:$0 sm:$0xff]  ;;  %s3944_s4 = sld [smem:[#allocation39_spill]] }
 0x25e   : > { %v1161_v31 = vrot.slane %v1153_v25, %v3625_v48  ;;  %v1177_v32 = vrot.slane %v1169_v26, %v3625_v48  ;;  %v1168_v50 = vrot.slane %v1154_v40, %v3625_v48  ;;  %v1184_v51 = vrot.slane %v1170_v42, %v3625_v48 }
 0x25f   : > { %v982_v33 = vrot.slane %v975_v27, %v3623_v41  ;;  %v990_v34 = vrot.slane %v2502_v28, %v3623_v41  ;;  %v998_v35 = vrot.slane %v991_v29, %v3623_v41  ;;  %v1006_v36 = vrot.slane %v2503_v30, %v3623_v41 }
 0x260   : > { %v1185_v37 = vcombine.low %v1161_v31, %v1177_v32  ;;  %v1186_v49 = vcombine.high %v1161_v31, %v1177_v32  ;;  %v1187_v55 = vcombine.low %v1168_v50, %v1184_v51  ;;  %v1188_v57 = vcombine.high %v1168_v50, %v1184_v51 }
 0x261   : > { %v1007_v38 = vcombine.low %v982_v33, %v990_v34  ;;  %v1023_v39 = vcombine.low %v998_v35, %v1006_v36  ;;  %v1008_v45 = vcombine.high %v982_v33, %v990_v34  ;;  %v1024_v46 = vcombine.high %v998_v35, %v1006_v36 }
 0x262   : > { %2602 = vmatpush3.xpose.msk.msra.mxu1 %vm1338_vm2, %v1185_v37  ;;  %v1335_v62 = vsub.f32 1.0, %v643_v61  ;;  %v894_v23 = vadd.f32 %v2500_v22, %v893_v59 }
 0x263   : > { %2606 = vmatprep.subr.mxu1 %v3166_v1  ;;  %v1015_v43 = vrot.slane %v1007_v38, %v3625_v48  ;;  %v1031_v44 = vrot.slane %v1023_v39, %v3625_v48  ;;  %v1022_v53 = vrot.slane %v1008_v45, %v3625_v48  ;;  %v1038_v54 = vrot.slane %v1024_v46, %v3625_v48 }
 0x264   : > { %vm1336_vm3 = vcmp.eq.f32.partialorder %v1335_v62, 1.0 }
 0x265   : > { %v1039_v47 = vcombine.low %v1015_v43, %v1031_v44  ;;  %v1040_v52 = vcombine.high %v1015_v43, %v1031_v44  ;;  %v1041_v56 = vcombine.low %v1022_v53, %v1038_v54  ;;  %v1042_v58 = vcombine.high %v1022_v53, %v1038_v54 }
 0x266   : > { %v1337_v63 = vsel %vm1336_vm3, -9.223372e+18, %v1335_v62 }
 0x267   : > { %2604 = vmatmul.mubr.msk.f32.vlgmr.msra.gmra.mrb[2].mxu1 %vm1338_vm2, %v1039_v47 }
 0x268   : > { %2607 = vmatpush3.xpose.msk.msra.mxu1 %vm1338_vm2, %v1186_v49  ;;  %2608 = vmatprep.mubr.msk.f32.mxu1 %vm3165_vm0, %v3166_v1 }
 0x269   : > { %2611 = vmatprep.subr.mxu1 %v3166_v1 }
 0x26b   : > { %2609 = vmatmul.mubr.msk.f32.vlgmr.msra.gmra.mrb[4].mxu1 %vm1338_vm2, %v1040_v52 }
 0x26c   : > { %2612 = vmatpush3.xpose.msk.msra.mxu1 %vm1338_vm2, %v1187_v55  ;;  %2613 = vmatprep.mubr.msk.f32.mxu1 %vm3165_vm0, %v3166_v1 }
 0x26d   : > { %2616 = vmatprep.subr.mxu1 %v3166_v1 }
 0x26f   : > { %2614 = vmatmul.mubr.msk.f32.vlgmr.msra.gmra.mrb[6].mxu1 %vm1338_vm2, %v1041_v56 }
 0x270   : > { %2617 = vmatpush3.xpose.msk.msra.mxu1 %vm1338_vm2, %v1188_v57  ;;  %2618 = vmatprep.mubr.msk.f32.mxu1 %vm3165_vm0, %v3166_v1 }
 0x271   : > { %2626 = vmatprep.subr.mxu1 %v3166_v1 }
 0x273   : > { %2619 = vmatmul.mubr.msk.f32.vlgmr.msra.gmra.mrb[8].mxu1 %vm1338_vm2, %v1042_v58 }
 0x274   : > { %2628 = vmatprep.mubr.msk.f32.mxu1 %vm3165_vm0, %v3166_v1 }
 0x33a   : > { %v1411_v2 = vpop.f32.mrb[2].mxu1 }
 0x33b   : > { %v1412_v3 = vadd.f32 %v1411_v2, %v1337_v63  ;;  %v2605_v4 = vpop.f32.mrb[3].mxu1 }
 0x33d   : > { %v1643_v5 = vmul.f32 0.35355338, %v1412_v3 }
 0x33e   : > { %v1487_v6 = vpop.f32.mrb[4].mxu1 }
 0x33f   : > { %v1488_v7 = vadd.f32 %v1487_v6, %v1337_v63  ;;  %v2610_v8 = vpop.f32.mrb[5].mxu1  ;;  %v1647_v9 = vsel %vm1338_vm2, %v1643_v5, -inf }
 0x340   : > { %1648 = vmax.xlane.f32.xlu0 %v1647_v9 }
 0x341   : > { %v1644_v10 = vmul.f32 0.35355338, %v1488_v7 }
 0x342   : > { %v1563_v11 = vpop.f32.mrb[6].mxu1 }
 0x343   : > { %v1564_v12 = vadd.f32 %v1563_v11, %v1337_v63  ;;  %v2615_v13 = vpop.f32.mrb[7].mxu1  ;;  %v1650_v14 = vsel %vm1338_vm2, %v1644_v10, -inf }
 0x344   : > { %1651 = vmax.xlane.f32.xlu1 %v1650_v14 }
 0x345   : > { %v1645_v15 = vmul.f32 0.35355338, %v1564_v12 }
 0x346   : > { %v1639_v16 = vpop.f32.mrb[8].mxu1 }
 0x347   : > { %v1640_v17 = vadd.f32 %v1639_v16, %v1337_v63  ;;  %v2620_v18 = vpop.f32.mrb[9].mxu1  ;;  %v1653_v19 = vsel %vm1338_vm2, %v1645_v15, -inf }
 0x348   : > { %1654 = vmax.xlane.f32.xlu0 %v1653_v19 }
 0x349   : > { %v1646_v20 = vmul.f32 0.35355338, %v1640_v17 }
 0x34b   : > { %v1656_v21 = vsel %vm1338_vm2, %v1646_v20, -inf }
 0x34c   : > { %1657 = vmax.xlane.f32.xlu0 %v1656_v21 }
 0x355   : > { %1190 = vrot.lane.b32.xlu1 %v894_v23, %s3168_s21  ;;  %s2531_s21 = sshll.u32 %s3942_s14, 9 }
 0x356   : > { %s3772_s19 = scalar_lea.hbm %s3944_s4, %s2531_s21 }
 0x3cd   : > { %v1649_v24 = vpop.xlane.xlu0 %1648 }
 0x3ce   : > { %v1659_v25 = vsub.f32 %v1643_v5, %v1649_v24 }
 0x3d0   : > { %v1663_v26 = vmul.f32 1.442695, %v1659_v25 }
 0x3d1   : > { %v1652_v27 = vpop.xlane.xlu1 %1651 }
 0x3d2   : > { %2803 = vpow2.f32 %v1663_v26  ;;  %v1660_v28 = vsub.f32 %v1644_v10, %v1652_v27 }
 0x3d4   : > { %v1665_v29 = vmul.f32 1.442695, %v1660_v28 }
 0x3d5   : > { %v1655_v30 = vpop.xlane.xlu0 %1654  ;;  %v1191_v45 = vpop.permute.xlu1 %1190 }
 0x3d6   : > { %2805 = vpow2.f32 %v1665_v29  ;;  %v1661_v31 = vsub.f32 %v1645_v15, %v1655_v30 }
 0x3d8   : > { %v1667_v32 = vmul.f32 1.442695, %v1661_v31 }
 0x3d9   : > { %v1658_v33 = vpop.xlane.xlu0 %1657 }
 0x3da   : > { %2807 = vpow2.f32 %v1667_v32  ;;  %v1662_v34 = vsub.f32 %v1646_v20, %v1658_v33 }
 0x3dc   : > { %v2804_v35 = vpop.eup %2803  ;;  %v1669_v36 = vmul.f32 1.442695, %v1662_v34 }
 0x3dd   : > { %v1671_v37 = vsel %vm1338_vm2, %v2804_v35, 0.0 }
 0x3de   : > { %2809 = vpow2.f32 %v1669_v36  ;;  %1672 = vadd.xlane.f32.xlu1 %v1671_v37  ;;  %v2141_v36 = vld [vmem:[%s3941_s23 + $0x8] sm:$0xff] }
 0x3e0   : > { %v2806_v38 = vpop.eup %2805 }
 0x3e1   : > { %v1674_v39 = vsel %vm1338_vm2, %v2806_v38, 0.0 }
 0x3e2   : > { %1675 = vadd.xlane.f32.xlu0 %v1674_v39 }
 0x3e4   : > { %v2808_v40 = vpop.eup %2807 }
 0x3e5   : > { %v1677_v42 = vsel %vm1338_vm2, %v2808_v40, 0.0 }
 0x3e6   : > { %1678 = vadd.xlane.f32.xlu1 %v1677_v42 }
 0x3e8   : > { %v2810_v43 = vpop.eup %2809 }
 0x3e9   : > { %v1680_v44 = vsel %vm1338_vm2, %v2810_v43, 0.0 }
 0x3ea   : > { %1681 = vadd.xlane.f32.xlu0 %v1680_v44 }
 0x3f7   : > { %1196 = vrot.lane.b32.xlu1 %v894_v23, %s3167_s12  ;;  %s3943_s12 = sld [smem:[#allocation29_spill]] }
 0x3fd   : > { %p3945_p12 = scmp.ne.s32.totalorder %s3943_s12, 0 }
 0x400   : > { %1193 = vrot.lane.b32.xlu0 %v894_v23, %s3169_s10  ;;  %s2259_s10 = sshll.u32 %s3696_s29, 4  ;;  %s3774_s10 = int_to_ptr.vmem [resolvable:$true] %s2259_s10 }
 0x401   : > { %s3023_s9 = scalar_lea.vmem %s3774_s10, 512  ;;  %p3030_p11 = scmp.lt.s32.totalorder %s3774_s10, %s3028_s25 }
 0x402   : > { %p3024_p13 = scmp.ne.s32.totalorder %s3774_s10, %s3023_s9 }
 0x404   : > { %p3025_p3 = pnand %p3024_p13, %p3945_p12 }
 0x406   : > { %p3026_p0 = pneg %p3025_p3 }
 0x46b   : > { %v1673_v46 = vpop.xlane.xlu1 %1672 }
 0x46c   : > { %2811 = vrcp.f32 %v1673_v46 }
 0x46f   : > { %v1676_v47 = vpop.xlane.xlu0 %1675 }
 0x470   : > { %2813 = vrcp.f32 %v1676_v47 }
 0x473   : > { %v1679_v49 = vpop.xlane.xlu1 %1678 }
 0x474   : > { %2815 = vrcp.f32 %v1679_v49 }
 0x476   : > { %v2812_v50 = vpop.eup %2811 }
 0x477   : > { %v1687_v51 = vmul.f32 %v2812_v50, %v2804_v35  ;;  %v1682_v52 = vpop.xlane.xlu0 %1681  ;;  %v1197_v53 = vpop.permute.xlu1 %1196  ;;  %v2140_v35 = vld [vmem:[%s3941_s23] sm:$0xff] }
 0x478   : > { %2817 = vrcp.f32 %v1682_v52  ;;  %v1215_v55 = vcombine.low %v1191_v45, %v1197_v53  ;;  %v1216_v56 = vcombine.high %v1191_v45, %v1197_v53  ;;  %v2671_v37 = vpack.c.bf16 %v2141_v36, %v2140_v35 }
 0x479   : > { %1691 = vst.msk [vmem:[%s3696_s29] sm:$0xff] %vm1338_vm2, %v1687_v51 }
 0x47a   : > { %v2814_v54 = vpop.eup %2813  ;;  %v1223_v62 = vrot.slane %v1215_v55, %v3623_v41  ;;  %v1230_v63 = vrot.slane %v1216_v56, %v3623_v41 }
 0x47b   : > { %v1688_v57 = vmul.f32 %v2814_v54, %v2806_v38  ;;  %v1194_v58 = vpop.permute.xlu0 %1193 }
 0x47c   : > { %v1199_v59 = vcombine.low %v894_v23, %v1194_v58  ;;  %v1200_v60 = vcombine.high %v894_v23, %v1194_v58  ;;  %v2142_v58 = vld [vmem:[%s3941_s23 + $0x10] sm:$0xff] }
 0x47d   : > { %1692 = vst.msk [vmem:[%s3696_s29 + $0x8] sm:$0xff] %vm1338_vm2, %v1688_v57 }
 0x47e   : > { %v2816_v61 = vpop.eup %2815  ;;  %v1207_v2 = vrot.slane %v1199_v59, %v3623_v41  ;;  %v1214_v3 = vrot.slane %v1200_v60, %v3623_v41  ;;  %v2143_v59 = vld [vmem:[%s3941_s23 + $0x18] sm:$0xff] }
 0x47f   : > { %v1689_v4 = vmul.f32 %v2816_v61, %v2808_v40 }
 0x480   : > { %v1231_v5 = vcombine.low %v1207_v2, %v1223_v62  ;;  %v1232_v6 = vcombine.high %v1207_v2, %v1223_v62  ;;  %v1247_v7 = vcombine.low %v1214_v3, %v1230_v63  ;;  %v1248_v8 = vcombine.high %v1214_v3, %v1230_v63 }
 0x481   : > { %1693 = vst.msk [vmem:[%s3696_s29 + $0x10] sm:$0xff] %vm1338_vm2, %v1689_v4  ;;  %v2674_v2 = vpack.c.bf16 %v2143_v59, %v2142_v58 }
 0x482   : > { %v2818_v9 = vpop.eup %2817  ;;  %v1239_v10 = vrot.slane %v1231_v5, %v3625_v48  ;;  %v1246_v11 = vrot.slane %v1232_v6, %v3625_v48  ;;  %v1255_v12 = vrot.slane %v1247_v7, %v3625_v48  ;;  %v1262_v13 = vrot.slane %v1248_v8, %v3625_v48 }
 0x483   : > { %v1690_v14 = vmul.f32 %v2818_v9, %v2810_v43 }
 0x484   : > { %v1267_v15 = vcombine.low %v1239_v10, %v1246_v11  ;;  %v2506_v16 = vcombine.high %v1239_v10, %v1246_v11  ;;  %v1283_v17 = vcombine.low %v1255_v12, %v1262_v13  ;;  %v2507_v18 = vcombine.high %v1255_v12, %v1262_v13 }
 0x485   : > { %1694 = vst.msk [vmem:[%s3696_s29 + $0x18] sm:$0xff] %vm1338_vm2, %v1690_v14  ;;  %s3029_s29 = scalar_lea.vmem %s3028_s25, 1024 }
 0x486   : > { %v1274_v19 = vrot.slane %v1267_v15, %v3623_v41  ;;  %v1282_v20 = vrot.slane %v2506_v16, %v3623_v41  ;;  %v1290_v21 = vrot.slane %v1283_v17, %v3623_v41  ;;  %v1298_v22 = vrot.slane %v2507_v18, %v3623_v41  ;;  %p3031_p9 = scmp.lt.s32.totalorder %s3029_s29, %s3023_s9 }
 0x488   : > { %v1299_v23 = vcombine.low %v1274_v19, %v1282_v20  ;;  %v1315_v24 = vcombine.low %v1290_v21, %v1298_v22  ;;  %v1300_v25 = vcombine.high %v1274_v19, %v1282_v20  ;;  %v1316_v26 = vcombine.high %v1290_v21, %v1298_v22  ;;  %p3032_p5 = por %p3031_p9, %p3030_p11 }
 0x48a   : > { %v1307_v27 = vrot.slane %v1299_v23, %v3625_v48  ;;  %v1323_v28 = vrot.slane %v1315_v24, %v3625_v48  ;;  %v1314_v29 = vrot.slane %v1300_v25, %v3625_v48  ;;  %v1330_v30 = vrot.slane %v1316_v26, %v3625_v48  ;;  %p3033_p7 = pnand %p3032_p5, %p3026_p0 }
 0x48c   : > { %v1331_v31 = vcombine.low %v1307_v27, %v1323_v28  ;;  %v1332_v32 = vcombine.high %v1307_v27, %v1323_v28  ;;  %v1333_v33 = vcombine.low %v1314_v29, %v1330_v30  ;;  %v1334_v34 = vcombine.high %v1314_v29, %v1330_v30 }
 0x48e   : > { %2622 = vmatpush3.msra.mxu0 %v1331_v31  ;;  %2627 = vmatpush3.msra.mxu1 %v1332_v32 }
 0x48f   : > { %2624 = vmatmul.mubr.msk.f32.vlgmr.msra.gmra.mrb[4].mxu0 %vm1338_vm2, %v1687_v51  ;;  %2629 = vmatmul.mubr.msk.f32.vlgmr.msra.gmra.mrb[10].mxu1 %vm1338_vm2, %v1688_v57 }
 0x490   : > { %2631 = vmatprep.subr.mxu0 %v3166_v1  ;;  %2636 = vmatprep.subr.mxu1 %v3166_v1 }
 0x491   : > { %2632 = vmatpush3.msra.mxu0 %v1333_v33  ;;  %2637 = vmatpush3.msra.mxu1 %v1334_v34 }
 0x492   : > { %2633 = vmatprep.mubr.msk.f32.mxu0 %vm3165_vm0, %v3166_v1  ;;  %2638 = vmatprep.mubr.msk.f32.mxu1 %vm3165_vm0, %v3166_v1 }
 0x493   : > { %2634 = vmatmul.mubr.msk.f32.vlgmr.msra.gmra.mrb[6].mxu0 %vm1338_vm2, %v1689_v4  ;;  %2639 = vmatmul.mubr.msk.f32.vlgmr.msra.gmra.mrb[12].mxu1 %vm1338_vm2, %v1690_v14 }
 0x494   : > { %2670 = vmatprep.subr.bf16.mxu0 %v3164_v0  ;;  %2649 = vmatprep.mubr.msk.f32.mxu0 %vm3165_vm0, %v3166_v1 }
 0x495   : > { %2672 = vmatpush3.bf16.msra.mxu0 %v2671_v37 }
 0x496   : > { %2673 = vmatprep.subr.bf16.mxu0 %v3164_v0 }
 0x499   : > { %2675 = vmatpush3.bf16.msra.mxu0 %v2674_v2 }
 0x562   : > { %v1764_v38 = vpop.f32.mrb[4].mxu0  ;;  %v1837_v39 = vpop.f32.mrb[10].mxu1 }
 0x563   : > { %v2625_v40 = vpop.f32.mrb[5].mxu0  ;;  %v2630_v42 = vpop.f32.mrb[11].mxu1 }
 0x566   : > { %v1910_v43 = vpop.f32.mrb[6].mxu0  ;;  %v1983_v44 = vpop.f32.mrb[12].mxu1 }
 0x567   : > { %v1987_v45 = vcombine.low %v1764_v38, %v1910_v43  ;;  %v1988_v1 = vcombine.high %v1764_v38, %v1910_v43  ;;  %v2003_v46 = vcombine.low %v1837_v39, %v1983_v44  ;;  %v2004_v47 = vcombine.high %v1837_v39, %v1983_v44  ;;  %v2635_v49 = vpop.f32.mrb[7].mxu0  ;;  %v2640_v50 = vpop.f32.mrb[13].mxu1 }
 0x569   : > { %v1995_v51 = vrot.slane %v1987_v45, %v3623_v41  ;;  %v2002_v52 = vrot.slane %v1988_v1, %v3623_v41  ;;  %v2011_v53 = vrot.slane %v2003_v46, %v3623_v41  ;;  %v2018_v0 = vrot.slane %v2004_v47, %v3623_v41 }
 0x56b   : > { %v2019_v54 = vcombine.low %v1995_v51, %v2011_v53  ;;  %v2020_v55 = vcombine.high %v1995_v51, %v2011_v53  ;;  %v2035_v56 = vcombine.low %v2002_v52, %v2018_v0  ;;  %v2036_v57 = vcombine.high %v2002_v52, %v2018_v0 }
 0x56d   : > { %v2027_v60 = vrot.slane %v2019_v54, %v3625_v48  ;;  %v2034_v61 = vrot.slane %v2020_v55, %v3625_v48  ;;  %v2043_v62 = vrot.slane %v2035_v56, %v3625_v48  ;;  %v2050_v63 = vrot.slane %v2036_v57, %v3625_v48 }
 0x56f   : > { %v2055_v3 = vcombine.low %v2027_v60, %v2034_v61  ;;  %v2520_v4 = vcombine.high %v2027_v60, %v2034_v61  ;;  %v2071_v5 = vcombine.low %v2043_v62, %v2050_v63  ;;  %v2521_v6 = vcombine.high %v2043_v62, %v2050_v63 }
 0x571   : > { %v2062_v7 = vrot.slane %v2055_v3, %v3623_v41  ;;  %v2070_v8 = vrot.slane %v2520_v4, %v3623_v41  ;;  %v2078_v9 = vrot.slane %v2071_v5, %v3623_v41  ;;  %v2086_v10 = vrot.slane %v2521_v6, %v3623_v41 }
 0x573   : > { %v2088_v11 = vcombine.high %v2062_v7, %v2070_v8  ;;  %v2104_v12 = vcombine.high %v2078_v9, %v2086_v10  ;;  %v2087_v13 = vcombine.low %v2062_v7, %v2070_v8  ;;  %v2103_v14 = vcombine.low %v2078_v9, %v2086_v10 }
 0x575   : > { %v2102_v15 = vrot.slane %v2088_v11, %v3625_v48  ;;  %v2118_v16 = vrot.slane %v2104_v12, %v3625_v48  ;;  %v2095_v17 = vrot.slane %v2087_v13, %v3625_v48  ;;  %v2111_v18 = vrot.slane %v2103_v14, %v3625_v48 }
 0x577   : > { %v2121_v19 = vcombine.low %v2102_v15, %v2118_v16  ;;  %v2120_v20 = vcombine.high %v2095_v17, %v2111_v18  ;;  %v2122_v21 = vcombine.high %v2102_v15, %v2118_v16  ;;  %v2119_v22 = vcombine.low %v2095_v17, %v2111_v18 }
 0x579   : > { %2128 = vrot.lane.b32.xlu0 %v2121_v19, %s3172_s16  ;;  %2124 = vrot.lane.b32.xlu1 %v2120_v20, %s3173_s13 }
 0x57d   : > { %2132 = vrot.lane.b32.xlu1 %v2122_v21, %s3174_s20 }
 0x5eb   : > { %v2125_v41 = vpop.permute.xlu1 %2124  ;;  %v2129_v23 = vpop.permute.xlu0 %2128 }
 0x5ec   : > { %v2135_v24 = vsel %vm1338_vm2, %v2119_v22, %v2125_v41 }
 0x5ed   : > { %v2137_v25 = vsel %vm2136_vm4, %v2135_v24, %v2129_v23 }
 0x5ef   : > { %v2133_v48 = vpop.permute.xlu1 %2132 }
 0x5f0   : > { %v2139_v26 = vsel %vm2138_vm5, %v2137_v25, %v2133_v48 }
 0x5f1   : > { %2650 = vmatmul.mubr.msk.f32.vlgmr.msra.gmra.mrb[8].mxu0 %vm655_vm1, %v2139_v26 }
 0x5f2   : > { %3036 = shalt.err (!%p3033_p7)
}
 0x5f3   : > { %s3037_s17 = scalar_lea.hbm %s3772_s19, 512  ;;  %s3041_s24 = scalar_lea.hbm %s3944_s4, 1024 }
 0x5f4   : > { %p3038_p10 = scmp.ne.s32.totalorder %s3772_s19, %s3037_s17  ;;  %p3042_p4 = scmp.lt.u32.totalorder %s3772_s19, %s3944_s4 }
 0x5f5   : > { %p3043_p1 = scmp.lt.u32.totalorder %s3041_s24, %s3037_s17  ;;  %p3045_p13 = scmp.lt.u32.totalorder %s3037_s17, %s3772_s19 }
 0x5f6   : > { %p3039_p6 = pnand %p3038_p10, %p3945_p12 }
 0x5f7   : > { %p3044_p8 = por %p3043_p1, %p3042_p4 }
 0x5f8   : > { %p3040_p2 = pneg %p3039_p6 }
 0x5f9   : > { %p3046_p3 = por %p3045_p13, %p3044_p8 }
 0x5fb   : > { %p3047_p0 = pnand %p3046_p3, %p3040_p2 }
 0x5fd   : > { %3050 = shalt.err (!%p3047_p0)
}
 0x5fe   : > { %s3176_s21 = smov 128   ;;  %s3946_s9 = sld [smem:[#allocation37_spill]] }
 0x5ff   : > { %2697 = dma.vmem_to_hbm [thread:$0]  (%p3945_p12), %s3774_s10, 512, %s3772_s19, %s2231_s15, %s3176_s21, %s3176_s21, %s3173_s13  }
 0x600   : > { %s2526_s18 = sshll.u32 %s3942_s14, 7  ;;  %s632_s25 = scalar_lea.vmem [#allocation14], %s3556_s22 }
 0x601   : > { %s2245_s29 = sshll.u32 %s632_s25, 4  ;;  %s3947_s6 = sld [smem:[#allocation38_spill]]  ;;  %s3811_s29 = int_to_ptr.vmem [resolvable:$true] %s2245_s29 }
 0x602   : > { %s2226_s13 = scalar_lea.sflag [#allocation4], %s3553_s28  ;;  %s3051_s10 = scalar_lea.vmem %s3811_s29, 128 }
 0x603   : > { %p3052_p11 = scmp.ne.s32.totalorder %s3811_s29, %s3051_s10  ;;  %s3177_s22 = smov [#allocation14]  }
 0x604   : > { %v2522_v27 = vld [vmem:[%s3946_s9] ss:$0 sm:$0xff]  ;;  %s3055_s14 = sshll.u32 %s3177_s22, 4  ;;  %s3056_s14 = int_to_ptr.vmem [resolvable:$false] %s3055_s14 }
 0x605   : > { %p3053_p9 = pnand %p3052_p11, %p3945_p12  ;;  %s3057_s19 = scalar_lea.vmem %s3056_s14, 256 }
 0x606   : > { %p3058_p7 = scmp.lt.s32.totalorder %s3811_s29, %s3056_s14  ;;  %p3059_p10 = scmp.lt.s32.totalorder %s3057_s19, %s3051_s10 }
 0x607   : > { %s3809_s24 = scalar_lea.hbm %s3947_s6, %s2526_s18  ;;  %p3054_p5 = pneg %p3053_p9 }
 0x608   : > { %p3060_p6 = por %p3059_p10, %p3058_p7 }
 0x60a   : > { %p3061_p2 = pnand %p3060_p6, %p3054_p5 }
 0x6c4   : > { %v2220_v28 = vpop.f32.mrb[8].mxu0 }
 0x6c5   : > { %v2221_v29 = vadd.f32 %v2522_v27, %v2220_v28  ;;  %v2651_v30 = vpop.f32.mrb[9].mxu0 }
 0x6c7   : > { %2224 = vst.msk [vmem:[%s632_s25] sm:$0xff] %vm655_vm1, %v2221_v29 }
 0x6c8   : > { %3064 = shalt.err (!%p3061_p2)
}
 0x6c9   : > { %s3065_s28 = scalar_lea.hbm %s3809_s24, 128  ;;  %s3069_s20 = scalar_lea.hbm %s3947_s6, 256 }
 0x6ca   : > { %p3066_p4 = scmp.ne.s32.totalorder %s3809_s24, %s3065_s28  ;;  %p3070_p13 = scmp.lt.u32.totalorder %s3809_s24, %s3947_s6 }
 0x6cb   : > { %p3071_p3 = scmp.lt.u32.totalorder %s3069_s20, %s3065_s28  ;;  %p3073_p11 = scmp.lt.u32.totalorder %s3065_s28, %s3809_s24 }
 0x6cc   : > { %p3067_p1 = pnand %p3066_p4, %p3945_p12 }
 0x6cd   : > { %p3072_p0 = por %p3071_p3, %p3070_p13 }
 0x6ce   : > { %p3068_p8 = pneg %p3067_p1 }
 0x6cf   : > { %p3074_p9 = por %p3073_p11, %p3072_p0 }
 0x6d1   : > { %p3075_p5 = pnand %p3074_p9, %p3068_p8 }
 0x6d3   : > { %3078 = shalt.err (!%p3075_p5)
}
 0x6d4   : > { %2696 = dma.vmem_to_hbm [thread:$0]  (%p3945_p12), %s3811_s29, 128, %s3809_s24, %s2226_s13  }
 0x6d5 PF: > { %s3948_s1 = sld [smem:[#allocation24_spill]]  ;;  %s3949_s9 = sld [smem:[#allocation27_spill]] }
 0x6d6   : > { %p3951_p10 = scmp.ge.s32.totalorder %s3153_s30, 2 }
 0x6db   : > { %s2274_s18 = sand.u32 1, %s3948_s1   ;;  %p3950_p7 = scmp.ne.s32.totalorder %s3949_s9, 0 }
 0x6dc   : > { %s2275_s25 = scalar_lea.sflag [#allocation4], %s2274_s18 }
 0x6dd   : > { %p2724_p6 = pnand %p3951_p10, %p3950_p7 }
 0x6df   : > { %3124 = dma.done.wait (!%p2724_p6), %s2275_s25, 128  }
 0x6e0   : > { %3126 = vsyncadd (!%p2724_p6), %s2275_s25, 4294967168  ;;  %s2284_s17 = scalar_lea.sflag [#allocation16], %s2274_s18 }
 0x6e1   : > { %3128 = dma.done.wait (!%p2724_p6), %s2284_s17, 512  }
 0x6e2   : > { %3130 = vsyncadd (!%p2724_p6), %s2284_s17, 4294966784  ;;  %s40_s30 = sadd.s32 1, %s3153_s30   ;;  %s3952_s12 = sld [smem:[#allocation30_spill]] }
 0x6e3   : > { %p37_p2 = scmp.ge.s32.totalorder %s40_s30, 4   ;;  %s3953_s28 = sld [smem:[#allocation26_spill]] }
 0x6e4   : > { %s3954_s29 = sld [smem:[#allocation28_spill]]  ;;  %s3955_s25 = smov %s3137_s26 }
 0x6e5   : > { %s3956_s26 = smov %s3141_s27  ;;  %39 = sbr.rel (!%p37_p2) target bundleno = 23 (0x17), region = 179 }
 0x6e8   : > { %s3957_s27 = smov %s3952_s12 }
 0x6ec   :  { %2289 = vsyncpa [#allocation3], 1 }
 0x6ed   :  { %2291 = vsyncpa [#allocation3 + $0x1], 1 }
 0x6ee   :  { %2292 = vsyncpa [#allocation6], 1 }
 0x6ef   :  { %2294 = vsyncpa [#allocation6 + $0x1], 1 }
 0x6f0   :  { %2295 = vsyncpa [#allocation9], 1 }
 0x6f1   :  { %2297 = vsyncpa [#allocation9 + $0x1], 1 }
 0x6f2   :  { %2298 = vsyncpa [#allocation12], 1 }
 0x6f3   :  { %2299 = vsyncpa [#allocation4], 1 }
 0x6f4   :  { %2301 = vsyncpa [#allocation4 + $0x1], 1 }
 0x6f5   :  { %2302 = vsyncpa [#allocation16], 1 }
 0x6f6   :  { %2304 = vsyncpa [#allocation16 + $0x1], 1 }

</bundles_post_ra>
